<compile_context>
chip_gen: v6e
topology: v6e:2x2x1
jax: 0.10.0
libtpu: 0.0.40
codegen_flags: <defaults>
</compile_context>

<pallas_src>
import jax
import jax.numpy as jnp
import numpy as np
from jax.experimental import pallas as pl
from jax.experimental.pallas import tpu as pltpu

# ---- small, module-consistent hyper-parameters -----------------------------
VOCAB_SIZE = 50
CHAR_SIZE = 30
POS_SIZE = 12
WORD_EMB = 16
CHAR_EMB = 16
POS_EMB = 8
WINDOW_SIZE = 2
WIN_LEN = 2 * WINDOW_SIZE + 1          # 5
HIDDEN = 32
OUTPUT = 5
BATCH = 8                              # windows per torch forward() call (= LSTM time)
CHAR_LEN = 15                          # prepare_char pads/truncates to 15
N_GROUPS = 4                           # groups of BATCH windows per pallas_call
WP_DIM = WIN_LEN * WORD_EMB + WIN_LEN * POS_EMB    # 120
WP_PAD = 128 - WP_DIM                              # zero-pad word+pos to 128 lanes
X1_DIM = 128 + 2 * HIDDEN                          # 192: [word|pos|pad|char]


# ---- Pallas kernel ----------------------------------------------------------
def window_classifier_kernel(
        xf_ref,     # [B, 2*CHAR_EMB]  row s = [char_emb14(s) | char_emb14(T-1-s)]
        wp_ref,     # [B, 128]         [word_concat | pos_concat | 0]
        wih_ref,    # [2*CHAR_EMB, 8H] gate-interleaved, per-direction block-diag, g cols x2
        bih_ref,    # [1, 8H]          gate-interleaved bias, g cols x2
        whh_ref,    # [2H, 8H]         gate-interleaved block-diag Whh.T, g cols x2
        w1_ref,     # [192, H]         rows [word 80 | pos 40 | zero 8 | char 64]
        b1_ref,     # [1, H]
        w2_ref,     # [H, H]
        b2_ref,     # [1, H]
        w3_ref,     # [H, OUTPUT]
        b3_ref,     # [1, OUTPUT]
        out_ref):   # [B, OUTPUT]
    H = HIDDEN
    T = BATCH

    # Hoisted input->hidden matmul: all 8 fused steps in one MXU pass.
    # Column layout: [i_f i_b f_f f_b g_f g_b o_f o_b], each H wide.
    gates_ih = (jnp.dot(xf_ref[...], wih_ref[...],
                        preferred_element_type=jnp.float32) + bih_ref[...])
    whh = whh_ref[...]

    h = jnp.zeros((1, 2 * H), jnp.float32)     # [h_fwd | h_bwd]
    c = jnp.zeros((1, 2 * H), jnp.float32)

    hf_rows = []                 # fwd hidden at time s   (appended in order)
    hb_rows = [None] * T         # bwd hidden at time T-1-s (placed at trace time)
    for s in range(T):           # static unroll; only h @ Whh stays serial
        gates = gates_ih[s:s + 1, :] + jnp.dot(h, whh,
                                               preferred_element_type=jnp.float32)
        sg = jax.nn.sigmoid(gates)             # ONE full-width [1, 8H] EUP pass
        i = sg[:, 0 * H:2 * H]                 # [i_f | i_b]
        f = sg[:, 2 * H:4 * H]                 # [f_f | f_b]
        g = 2.0 * sg[:, 4 * H:6 * H] - 1.0     # tanh(x) = 2*sigmoid(2x) - 1
        o = sg[:, 6 * H:8 * H]                 # [o_f | o_b]
        c = f * c + i * g
        h = o * jnp.tanh(c)
        hf_rows.append(h[:, 0:H])
        hb_rows[T - 1 - s] = h[:, H:2 * H]

    # char_feat row t = [h_fwd(t) | h_bwd(t)]  ==  _1[:, -1, :]
    char_feat = jnp.concatenate(
        [jnp.concatenate(hf_rows, axis=0),
         jnp.concatenate(hb_rows, axis=0)], axis=1)        # [T, 2H]

    # h_layer1: single fused matmul over [word|pos|pad|char] lanes.
    x1 = jnp.concatenate([wp_ref[...], char_feat], axis=1)  # [T, 192]
    h0 = jax.nn.sigmoid(
        jnp.dot(x1, w1_ref[...], preferred_element_type=jnp.float32) + b1_ref[...])
    h1 = jax.nn.sigmoid(
        jnp.dot(h0, w2_ref[...], preferred_element_type=jnp.float32) + b2_ref[...])
    logits = jnp.dot(h1, w3_ref[...], preferred_element_type=jnp.float32) + b3_ref[...]

    # LogSoftmax(dim=1)
    m = jnp.max(logits, axis=1, keepdims=True)
    z = logits - m
    lse = jnp.log(jnp.sum(jnp.exp(z), axis=1, keepdims=True))
    out_ref[...] = z - lse
    # TODO(synk): dropout (is_training=True path) is not implemented; this is
    # the inference forward only.


# ---- host-side parameter packing --------------------------------------------
def _fuse_dir_cols(wf_t, wb_t, H):
    """Per-direction block-diagonal, gate-interleaved columns.

    wf_t: [Kf, 4H] (cols [i|f|g|o] fwd), wb_t: [Kb, 4H] (bwd)
    -> [Kf+Kb, 8H] with cols [i_f i_b f_f f_b g_f g_b o_f o_b]."""
    Kf, Kb = wf_t.shape[0], wb_t.shape[0]
    out = jnp.zeros((Kf + Kb, 8 * H), jnp.float32)
    for gi in range(4):
        out = out.at[:Kf, (2 * gi) * H:(2 * gi + 1) * H].set(
            wf_t[:, gi * H:(gi + 1) * H])
        out = out.at[Kf:, (2 * gi + 1) * H:(2 * gi + 2) * H].set(
            wb_t[:, gi * H:(gi + 1) * H])
    return out


def _fuse_dir_bias(bf, bb, H):
    out = jnp.zeros((1, 8 * H), jnp.float32)
    for gi in range(4):
        out = out.at[:, (2 * gi) * H:(2 * gi + 1) * H].set(bf[:, gi * H:(gi + 1) * H])
        out = out.at[:, (2 * gi + 1) * H:(2 * gi + 2) * H].set(bb[:, gi * H:(gi + 1) * H])
    return out


def _scale_g_cols(w, H):
    # tanh(x) = 2*sigmoid(2x) - 1: pre-scale g-gate columns (weights AND bias).
    return w.at[..., 4 * H:6 * H].multiply(2.0)


def pack_params(params):
    H = HIDDEN
    f32 = jnp.float32
    wih = _scale_g_cols(_fuse_dir_cols(params['wih_f'].T, params['wih_b'].T, H), H)
    whh = _scale_g_cols(_fuse_dir_cols(params['whh_f'].T, params['whh_b'].T, H), H)
    bih = _scale_g_cols(_fuse_dir_bias(params['b_f'], params['b_b'], H), H)
    # [192, H]: word rows (80), pos rows (40), zero rows (8, wp lane pad), char rows (64)
    w1_all = jnp.concatenate([params['w1w'].T, params['w1p'].T,
                              jnp.zeros((WP_PAD, H), f32), params['w1c'].T], axis=0)
    return {
        'word_embed': params['word_embed'],
        'char_embed': params['char_embed'],
        'pos_embed': params['pos_embed'],
        'wih': wih, 'bih': bih, 'whh': whh,
        'w1_all': w1_all, 'b1': params['b1'],
        'w2_t': params['w2'].T, 'b2': params['b2'],
        'w3_t': params['w3'].T, 'b3': params['b3'],
    }


def _resident(arr):
    # Weights: same block every grid step -> fetched once, stay in VMEM.
    return pl.BlockSpec(arr.shape, lambda g: (0, 0))


@jax.jit
def forward(packed, inputs, char, pos):
    """Inference path of WindowClassifierWithCharEmb.forward (is_training=False).

    Processes N = n_groups * BATCH windows; each group of BATCH windows is one
    torch forward() call (the LSTM time axis runs over that group's windows)."""
    N = inputs.shape[0]
    n_groups = N // BATCH

    # ---- embedding gathers (glue, plain JAX) --------------------------------
    word_concat = packed['word_embed'][inputs].reshape(N, WIN_LEN * WORD_EMB)
    pos_concat = packed['pos_embed'][pos].reshape(N, WIN_LEN * POS_EMB)
    wp = jnp.concatenate(
        [word_concat, pos_concat, jnp.zeros((N, WP_PAD), jnp.float32)], axis=1)  # [N,128]

    # Only char lane 14 of the LSTM output is ever consumed, and batch lanes
    # never interact -> gather just that lane's embedding.
    x14 = packed['char_embed'][char[:, CHAR_LEN - 1]]                 # [N, CHAR_EMB]
    xg = x14.reshape(n_groups, BATCH, CHAR_EMB)
    # Fused fwd/bwd step input: row s of group g = [x14(g, s) | x14(g, T-1-s)].
    x_fused = jnp.concatenate([xg, jnp.flip(xg, axis=1)],
                              axis=-1).reshape(N, 2 * CHAR_EMB)       # [N, 32]

    weight_args = (packed['wih'], packed['bih'], packed['whh'],
                   packed['w1_all'], packed['b1'],
                   packed['w2_t'], packed['b2'],
                   packed['w3_t'], packed['b3'])

    return pl.pallas_call(
        window_classifier_kernel,
        out_shape=jax.ShapeDtypeStruct((N, OUTPUT), jnp.float32),
        grid=(n_groups,),
        in_specs=[
            pl.BlockSpec((BATCH, 2 * CHAR_EMB), lambda g: (g, 0)),
            pl.BlockSpec((BATCH, 128), lambda g: (g, 0)),
            *[_resident(w) for w in weight_args],
        ],
        out_specs=pl.BlockSpec((BATCH, OUTPUT), lambda g: (g, 0)),
        compiler_params=pltpu.CompilerParams(
            dimension_semantics=("parallel",)),      # shard groups across v7x TCs
    )(x_fused, wp, *weight_args)


# ---- pure-JAX reference (full 15-lane LSTM, raw torch-layout params) ---------
def forward_ref(params, inputs, char, pos):
    H = HIDDEN
    N = inputs.shape[0]
    outs = []
    for g0 in range(0, N, BATCH):
        sl = slice(g0, g0 + BATCH)
        word_concat = params['word_embed'][inputs[sl]].reshape(BATCH, -1)
        pos_concat = params['pos_embed'][pos[sl]].reshape(BATCH, -1)
        char_e = params['char_embed'][char[sl]]                 # [B, 15, CHAR_EMB]

        def cell(x_t, h, c, wih, whh, b):
            gates = x_t @ wih.T + h @ whh.T + b
            i = jax.nn.sigmoid(gates[:, :H]); f = jax.nn.sigmoid(gates[:, H:2 * H])
            gg = jnp.tanh(gates[:, 2 * H:3 * H]); o = jax.nn.sigmoid(gates[:, 3 * H:])
            c = f * c + i * gg
            return o * jnp.tanh(c), c

        zeros = jnp.zeros((CHAR_LEN, H), jnp.float32)
        h, c = zeros, zeros; fwd = []
        for t in range(BATCH):
            h, c = cell(char_e[t], h, c, params['wih_f'], params['whh_f'], params['b_f'])
            fwd.append(h[-1])
        fwd = jnp.stack(fwd)
        h, c = zeros, zeros; bwd = [None] * BATCH
        for t in range(BATCH - 1, -1, -1):
            h, c = cell(char_e[t], h, c, params['wih_b'], params['whh_b'], params['b_b'])
            bwd[t] = h[-1]
        bwd = jnp.stack(bwd)
        char_feat = jnp.concatenate([fwd, bwd], axis=-1)

        pre1 = (word_concat @ params['w1w'].T + char_feat @ params['w1c'].T
                + pos_concat @ params['w1p'].T + params['b1'])
        h0 = jax.nn.sigmoid(pre1)
        h1 = jax.nn.sigmoid(h0 @ params['w2'].T + params['b2'])
        logits = h1 @ params['w3'].T + params['b3']
        outs.append(jax.nn.log_softmax(logits, axis=1))
    return jnp.concatenate(outs, axis=0)


# ---- deterministic parameter construction (PyTorch layout) ------------------
def make_params(key):
    def nrm(k, shape, scale=0.1):
        return (scale * jax.random.normal(k, shape)).astype(jnp.float32)

    ks = jax.random.split(key, 20)
    H = HIDDEN
    return {
        'word_embed': nrm(ks[0], (VOCAB_SIZE, WORD_EMB), 1.0),
        'char_embed': nrm(ks[1], (CHAR_SIZE, CHAR_EMB), 1.0),
        'pos_embed': nrm(ks[2], (POS_SIZE, POS_EMB), 1.0),
        # bidirectional LSTM (input=CHAR_EMB, hidden=H); biases are b_ih+b_hh
        'wih_f': nrm(ks[3], (4 * H, CHAR_EMB)),
        'whh_f': nrm(ks[4], (4 * H, H)),
        'b_f': nrm(ks[5], (1, 4 * H)),
        'wih_b': nrm(ks[6], (4 * H, CHAR_EMB)),
        'whh_b': nrm(ks[7], (4 * H, H)),
        'b_b': nrm(ks[8], (1, 4 * H)),
        # h_layer1 weight split over the cat([word, char_lstm, pos]) blocks
        'w1w': nrm(ks[9], (H, WIN_LEN * WORD_EMB)),
        'w1c': nrm(ks[10], (H, 2 * H)),
        'w1p': nrm(ks[11], (H, WIN_LEN * POS_EMB)),
        'b1': nrm(ks[12], (1, H)),
        'w2': nrm(ks[13], (H, H)),
        'b2': nrm(ks[14], (1, H)),
        'w3': nrm(ks[15], (OUTPUT, H)),
        'b3': nrm(ks[16], (1, OUTPUT)),
    }


if __name__ == "__main__":
    key = jax.random.PRNGKey(0)
    k_in, k_ch, k_pos, k_par = jax.random.split(key, 4)

    N = N_GROUPS * BATCH   # 32 windows = 4 torch forward() calls in one kernel launch
    inputs = jax.random.randint(k_in, (N, WIN_LEN), 0, VOCAB_SIZE, dtype=jnp.int32)
    char = jax.random.randint(k_ch, (N, CHAR_LEN), 0, CHAR_SIZE, dtype=jnp.int32)
    pos = jax.random.randint(k_pos, (N, WIN_LEN), 0, POS_SIZE, dtype=jnp.int32)

    params = make_params(k_par)
    packed = pack_params(params)

    out = jax.block_until_ready(forward(packed, inputs, char, pos))

    ref = forward_ref(params, inputs, char, pos)
    np.testing.assert_allclose(np.asarray(out), np.asarray(ref), rtol=5e-3, atol=5e-3)

    # log-softmax rows should (log-)normalize
    assert np.allclose(np.exp(np.asarray(out)).sum(axis=1), 1.0, atol=1e-3)

    print("KERNEL_OK")
</pallas_src>

<mosaic_0001>
module attributes {stable_mosaic.version = 11 : i64} {
  func.func @window_classifier_kernel(%arg0: i32, %arg1: memref<8x32xf32, #tpu.memory_space<vmem>>, %arg2: memref<8x128xf32, #tpu.memory_space<vmem>>, %arg3: memref<32x256xf32, #tpu.memory_space<vmem>>, %arg4: memref<1x256xf32, #tpu.memory_space<vmem>>, %arg5: memref<64x256xf32, #tpu.memory_space<vmem>>, %arg6: memref<192x32xf32, #tpu.memory_space<vmem>>, %arg7: memref<1x32xf32, #tpu.memory_space<vmem>>, %arg8: memref<32x32xf32, #tpu.memory_space<vmem>>, %arg9: memref<1x32xf32, #tpu.memory_space<vmem>>, %arg10: memref<32x5xf32, #tpu.memory_space<vmem>>, %arg11: memref<1x5xf32, #tpu.memory_space<vmem>>, %arg12: memref<8x5xf32, #tpu.memory_space<vmem>>) attributes {dimension_semantics = [#tpu.dimension_semantics<parallel>], iteration_bounds = array<i64: 4>, scalar_prefetch = 0 : i64, scratch_operands = 0 : i64, tpu.core_type = #tpu.core_type<tc>, window_params = [{transform_indices = @transform_0, window_bounds = array<i64: 8, 32>}, {transform_indices = @transform_1, window_bounds = array<i64: 8, 128>}, {pipeline_mode = #tpu.pipeline_mode<synchronous>, transform_indices = @transform_2, window_bounds = array<i64: 32, 256>}, {pipeline_mode = #tpu.pipeline_mode<synchronous>, transform_indices = @transform_3, window_bounds = array<i64: 1, 256>}, {pipeline_mode = #tpu.pipeline_mode<synchronous>, transform_indices = @transform_4, window_bounds = array<i64: 64, 256>}, {pipeline_mode = #tpu.pipeline_mode<synchronous>, transform_indices = @transform_5, window_bounds = array<i64: 192, 32>}, {pipeline_mode = #tpu.pipeline_mode<synchronous>, transform_indices = @transform_6, window_bounds = array<i64: 1, 32>}, {pipeline_mode = #tpu.pipeline_mode<synchronous>, transform_indices = @transform_7, window_bounds = array<i64: 32, 32>}, {pipeline_mode = #tpu.pipeline_mode<synchronous>, transform_indices = @transform_8, window_bounds = array<i64: 1, 32>}, {pipeline_mode = #tpu.pipeline_mode<synchronous>, transform_indices = @transform_9, window_bounds = array<i64: 32, 5>}, {pipeline_mode = #tpu.pipeline_mode<synchronous>, transform_indices = @transform_10, window_bounds = array<i64: 1, 5>}, {transform_indices = @transform_11, window_bounds = array<i64: 8, 5>}]} {
    %c0 = arith.constant 0 : index
    %c0_0 = arith.constant 0 : index
    %0 = vector.load %arg1[%c0, %c0_0] : memref<8x32xf32, #tpu.memory_space<vmem>>, vector<8x32xf32>
    %c0_1 = arith.constant 0 : index
    %c0_2 = arith.constant 0 : index
    %1 = vector.load %arg3[%c0_1, %c0_2] : memref<32x256xf32, #tpu.memory_space<vmem>>, vector<32x256xf32>
    %cst = arith.constant dense<0.000000e+00> : vector<8x256xf32>
    %2 = tpu.matmul %0, %1, %cst {dimension_numbers = #tpu.dot_dimension_numbers<[1], [0], [0], [1], [0, 0, 1, 1], [], []>} : vector<8x32xf32>, vector<32x256xf32>, vector<8x256xf32> -> vector<8x256xf32>
    %c0_3 = arith.constant 0 : index
    %c0_4 = arith.constant 0 : index
    %3 = vector.load %arg4[%c0_3, %c0_4] : memref<1x256xf32, #tpu.memory_space<vmem>>, vector<1x256xf32>
    %4 = vector.broadcast %3 : vector<1x256xf32> to vector<8x256xf32>
    %5 = arith.addf %2, %4 : vector<8x256xf32>
    %c0_5 = arith.constant 0 : index
    %c0_6 = arith.constant 0 : index
    %6 = vector.load %arg5[%c0_5, %c0_6] : memref<64x256xf32, #tpu.memory_space<vmem>>, vector<64x256xf32>
    %cst_7 = arith.constant 0.000000e+00 : f32
    %7 = vector.broadcast %cst_7 : f32 to vector<1x64xf32>
    %cst_8 = arith.constant 0.000000e+00 : f32
    %8 = vector.broadcast %cst_8 : f32 to vector<1x64xf32>
    %9 = vector.extract_strided_slice %5 {offsets = [0, 0], sizes = [1, 256], strides = [1, 1]} : vector<8x256xf32> to vector<1x256xf32>
    %cst_9 = arith.constant dense<0.000000e+00> : vector<1x256xf32>
    %10 = tpu.matmul %7, %6, %cst_9 {dimension_numbers = #tpu.dot_dimension_numbers<[1], [0], [0], [1], [0, 0, 1, 1], [], []>} : vector<1x64xf32>, vector<64x256xf32>, vector<1x256xf32> -> vector<1x256xf32>
    %11 = arith.addf %9, %10 : vector<1x256xf32>
    %12 = arith.negf %11 : vector<1x256xf32>
    %13 = math.exp %12 : vector<1x256xf32>
    %cst_10 = arith.constant 1.000000e+00 : f32
    %14 = vector.broadcast %cst_10 : f32 to vector<1x256xf32>
    %15 = arith.addf %14, %13 : vector<1x256xf32>
    %16 = arith.divf %14, %15 : vector<1x256xf32>
    %17 = vector.extract_strided_slice %16 {offsets = [0, 0], sizes = [1, 64], strides = [1, 1]} : vector<1x256xf32> to vector<1x64xf32>
    %18 = vector.extract_strided_slice %16 {offsets = [0, 64], sizes = [1, 64], strides = [1, 1]} : vector<1x256xf32> to vector<1x64xf32>
    %19 = vector.extract_strided_slice %16 {offsets = [0, 128], sizes = [1, 64], strides = [1, 1]} : vector<1x256xf32> to vector<1x64xf32>
    %cst_11 = arith.constant 2.000000e+00 : f32
    %20 = vector.broadcast %cst_11 : f32 to vector<1x64xf32>
    %21 = arith.mulf %20, %19 : vector<1x64xf32>
    %cst_12 = arith.constant 1.000000e+00 : f32
    %22 = vector.broadcast %cst_12 : f32 to vector<1x64xf32>
    %23 = arith.subf %21, %22 : vector<1x64xf32>
    %24 = vector.extract_strided_slice %16 {offsets = [0, 192], sizes = [1, 64], strides = [1, 1]} : vector<1x256xf32> to vector<1x64xf32>
    %25 = arith.mulf %18, %8 : vector<1x64xf32>
    %26 = arith.mulf %17, %23 : vector<1x64xf32>
    %27 = arith.addf %25, %26 : vector<1x64xf32>
    %28 = math.tanh %27 : vector<1x64xf32>
    %29 = arith.mulf %24, %28 : vector<1x64xf32>
    %30 = vector.extract_strided_slice %29 {offsets = [0, 0], sizes = [1, 32], strides = [1, 1]} : vector<1x64xf32> to vector<1x32xf32>
    %31 = vector.extract_strided_slice %29 {offsets = [0, 32], sizes = [1, 32], strides = [1, 1]} : vector<1x64xf32> to vector<1x32xf32>
    %32 = vector.extract_strided_slice %5 {offsets = [1, 0], sizes = [1, 256], strides = [1, 1]} : vector<8x256xf32> to vector<1x256xf32>
    %cst_13 = arith.constant dense<0.000000e+00> : vector<1x256xf32>
    %33 = tpu.matmul %29, %6, %cst_13 {dimension_numbers = #tpu.dot_dimension_numbers<[1], [0], [0], [1], [0, 0, 1, 1], [], []>} : vector<1x64xf32>, vector<64x256xf32>, vector<1x256xf32> -> vector<1x256xf32>
    %34 = arith.addf %32, %33 : vector<1x256xf32>
    %35 = arith.negf %34 : vector<1x256xf32>
    %36 = math.exp %35 : vector<1x256xf32>
    %cst_14 = arith.constant 1.000000e+00 : f32
    %37 = vector.broadcast %cst_14 : f32 to vector<1x256xf32>
    %38 = arith.addf %37, %36 : vector<1x256xf32>
    %39 = arith.divf %37, %38 : vector<1x256xf32>
    %40 = vector.extract_strided_slice %39 {offsets = [0, 0], sizes = [1, 64], strides = [1, 1]} : vector<1x256xf32> to vector<1x64xf32>
    %41 = vector.extract_strided_slice %39 {offsets = [0, 64], sizes = [1, 64], strides = [1, 1]} : vector<1x256xf32> to vector<1x64xf32>
    %42 = vector.extract_strided_slice %39 {offsets = [0, 128], sizes = [1, 64], strides = [1, 1]} : vector<1x256xf32> to vector<1x64xf32>
    %cst_15 = arith.constant 2.000000e+00 : f32
    %43 = vector.broadcast %cst_15 : f32 to vector<1x64xf32>
    %44 = arith.mulf %43, %42 : vector<1x64xf32>
    %cst_16 = arith.constant 1.000000e+00 : f32
    %45 = vector.broadcast %cst_16 : f32 to vector<1x64xf32>
    %46 = arith.subf %44, %45 : vector<1x64xf32>
    %47 = vector.extract_strided_slice %39 {offsets = [0, 192], sizes = [1, 64], strides = [1, 1]} : vector<1x256xf32> to vector<1x64xf32>
    %48 = arith.mulf %41, %27 : vector<1x64xf32>
    %49 = arith.mulf %40, %46 : vector<1x64xf32>
    %50 = arith.addf %48, %49 : vector<1x64xf32>
    %51 = math.tanh %50 : vector<1x64xf32>
    %52 = arith.mulf %47, %51 : vector<1x64xf32>
    %53 = vector.extract_strided_slice %52 {offsets = [0, 0], sizes = [1, 32], strides = [1, 1]} : vector<1x64xf32> to vector<1x32xf32>
    %54 = vector.extract_strided_slice %52 {offsets = [0, 32], sizes = [1, 32], strides = [1, 1]} : vector<1x64xf32> to vector<1x32xf32>
    %55 = vector.extract_strided_slice %5 {offsets = [2, 0], sizes = [1, 256], strides = [1, 1]} : vector<8x256xf32> to vector<1x256xf32>
    %cst_17 = arith.constant dense<0.000000e+00> : vector<1x256xf32>
    %56 = tpu.matmul %52, %6, %cst_17 {dimension_numbers = #tpu.dot_dimension_numbers<[1], [0], [0], [1], [0, 0, 1, 1], [], []>} : vector<1x64xf32>, vector<64x256xf32>, vector<1x256xf32> -> vector<1x256xf32>
    %57 = arith.addf %55, %56 : vector<1x256xf32>
    %58 = arith.negf %57 : vector<1x256xf32>
    %59 = math.exp %58 : vector<1x256xf32>
    %cst_18 = arith.constant 1.000000e+00 : f32
    %60 = vector.broadcast %cst_18 : f32 to vector<1x256xf32>
    %61 = arith.addf %60, %59 : vector<1x256xf32>
    %62 = arith.divf %60, %61 : vector<1x256xf32>
    %63 = vector.extract_strided_slice %62 {offsets = [0, 0], sizes = [1, 64], strides = [1, 1]} : vector<1x256xf32> to vector<1x64xf32>
    %64 = vector.extract_strided_slice %62 {offsets = [0, 64], sizes = [1, 64], strides = [1, 1]} : vector<1x256xf32> to vector<1x64xf32>
    %65 = vector.extract_strided_slice %62 {offsets = [0, 128], sizes = [1, 64], strides = [1, 1]} : vector<1x256xf32> to vector<1x64xf32>
    %cst_19 = arith.constant 2.000000e+00 : f32
    %66 = vector.broadcast %cst_19 : f32 to vector<1x64xf32>
    %67 = arith.mulf %66, %65 : vector<1x64xf32>
    %cst_20 = arith.constant 1.000000e+00 : f32
    %68 = vector.broadcast %cst_20 : f32 to vector<1x64xf32>
    %69 = arith.subf %67, %68 : vector<1x64xf32>
    %70 = vector.extract_strided_slice %62 {offsets = [0, 192], sizes = [1, 64], strides = [1, 1]} : vector<1x256xf32> to vector<1x64xf32>
    %71 = arith.mulf %64, %50 : vector<1x64xf32>
    %72 = arith.mulf %63, %69 : vector<1x64xf32>
    %73 = arith.addf %71, %72 : vector<1x64xf32>
    %74 = math.tanh %73 : vector<1x64xf32>
    %75 = arith.mulf %70, %74 : vector<1x64xf32>
    %76 = vector.extract_strided_slice %75 {offsets = [0, 0], sizes = [1, 32], strides = [1, 1]} : vector<1x64xf32> to vector<1x32xf32>
    %77 = vector.extract_strided_slice %75 {offsets = [0, 32], sizes = [1, 32], strides = [1, 1]} : vector<1x64xf32> to vector<1x32xf32>
    %78 = vector.extract_strided_slice %5 {offsets = [3, 0], sizes = [1, 256], strides = [1, 1]} : vector<8x256xf32> to vector<1x256xf32>
    %cst_21 = arith.constant dense<0.000000e+00> : vector<1x256xf32>
    %79 = tpu.matmul %75, %6, %cst_21 {dimension_numbers = #tpu.dot_dimension_numbers<[1], [0], [0], [1], [0, 0, 1, 1], [], []>} : vector<1x64xf32>, vector<64x256xf32>, vector<1x256xf32> -> vector<1x256xf32>
    %80 = arith.addf %78, %79 : vector<1x256xf32>
    %81 = arith.negf %80 : vector<1x256xf32>
    %82 = math.exp %81 : vector<1x256xf32>
    %cst_22 = arith.constant 1.000000e+00 : f32
    %83 = vector.broadcast %cst_22 : f32 to vector<1x256xf32>
    %84 = arith.addf %83, %82 : vector<1x256xf32>
    %85 = arith.divf %83, %84 : vector<1x256xf32>
    %86 = vector.extract_strided_slice %85 {offsets = [0, 0], sizes = [1, 64], strides = [1, 1]} : vector<1x256xf32> to vector<1x64xf32>
    %87 = vector.extract_strided_slice %85 {offsets = [0, 64], sizes = [1, 64], strides = [1, 1]} : vector<1x256xf32> to vector<1x64xf32>
    %88 = vector.extract_strided_slice %85 {offsets = [0, 128], sizes = [1, 64], strides = [1, 1]} : vector<1x256xf32> to vector<1x64xf32>
    %cst_23 = arith.constant 2.000000e+00 : f32
    %89 = vector.broadcast %cst_23 : f32 to vector<1x64xf32>
    %90 = arith.mulf %89, %88 : vector<1x64xf32>
    %cst_24 = arith.constant 1.000000e+00 : f32
    %91 = vector.broadcast %cst_24 : f32 to vector<1x64xf32>
    %92 = arith.subf %90, %91 : vector<1x64xf32>
    %93 = vector.extract_strided_slice %85 {offsets = [0, 192], sizes = [1, 64], strides = [1, 1]} : vector<1x256xf32> to vector<1x64xf32>
    %94 = arith.mulf %87, %73 : vector<1x64xf32>
    %95 = arith.mulf %86, %92 : vector<1x64xf32>
    %96 = arith.addf %94, %95 : vector<1x64xf32>
    %97 = math.tanh %96 : vector<1x64xf32>
    %98 = arith.mulf %93, %97 : vector<1x64xf32>
    %99 = vector.extract_strided_slice %98 {offsets = [0, 0], sizes = [1, 32], strides = [1, 1]} : vector<1x64xf32> to vector<1x32xf32>
    %100 = vector.extract_strided_slice %98 {offsets = [0, 32], sizes = [1, 32], strides = [1, 1]} : vector<1x64xf32> to vector<1x32xf32>
    %101 = vector.extract_strided_slice %5 {offsets = [4, 0], sizes = [1, 256], strides = [1, 1]} : vector<8x256xf32> to vector<1x256xf32>
    %cst_25 = arith.constant dense<0.000000e+00> : vector<1x256xf32>
    %102 = tpu.matmul %98, %6, %cst_25 {dimension_numbers = #tpu.dot_dimension_numbers<[1], [0], [0], [1], [0, 0, 1, 1], [], []>} : vector<1x64xf32>, vector<64x256xf32>, vector<1x256xf32> -> vector<1x256xf32>
    %103 = arith.addf %101, %102 : vector<1x256xf32>
    %104 = arith.negf %103 : vector<1x256xf32>
    %105 = math.exp %104 : vector<1x256xf32>
    %cst_26 = arith.constant 1.000000e+00 : f32
    %106 = vector.broadcast %cst_26 : f32 to vector<1x256xf32>
    %107 = arith.addf %106, %105 : vector<1x256xf32>
    %108 = arith.divf %106, %107 : vector<1x256xf32>
    %109 = vector.extract_strided_slice %108 {offsets = [0, 0], sizes = [1, 64], strides = [1, 1]} : vector<1x256xf32> to vector<1x64xf32>
    %110 = vector.extract_strided_slice %108 {offsets = [0, 64], sizes = [1, 64], strides = [1, 1]} : vector<1x256xf32> to vector<1x64xf32>
    %111 = vector.extract_strided_slice %108 {offsets = [0, 128], sizes = [1, 64], strides = [1, 1]} : vector<1x256xf32> to vector<1x64xf32>
    %cst_27 = arith.constant 2.000000e+00 : f32
    %112 = vector.broadcast %cst_27 : f32 to vector<1x64xf32>
    %113 = arith.mulf %112, %111 : vector<1x64xf32>
    %cst_28 = arith.constant 1.000000e+00 : f32
    %114 = vector.broadcast %cst_28 : f32 to vector<1x64xf32>
    %115 = arith.subf %113, %114 : vector<1x64xf32>
    %116 = vector.extract_strided_slice %108 {offsets = [0, 192], sizes = [1, 64], strides = [1, 1]} : vector<1x256xf32> to vector<1x64xf32>
    %117 = arith.mulf %110, %96 : vector<1x64xf32>
    %118 = arith.mulf %109, %115 : vector<1x64xf32>
    %119 = arith.addf %117, %118 : vector<1x64xf32>
    %120 = math.tanh %119 : vector<1x64xf32>
    %121 = arith.mulf %116, %120 : vector<1x64xf32>
    %122 = vector.extract_strided_slice %121 {offsets = [0, 0], sizes = [1, 32], strides = [1, 1]} : vector<1x64xf32> to vector<1x32xf32>
    %123 = vector.extract_strided_slice %121 {offsets = [0, 32], sizes = [1, 32], strides = [1, 1]} : vector<1x64xf32> to vector<1x32xf32>
    %124 = vector.extract_strided_slice %5 {offsets = [5, 0], sizes = [1, 256], strides = [1, 1]} : vector<8x256xf32> to vector<1x256xf32>
    %cst_29 = arith.constant dense<0.000000e+00> : vector<1x256xf32>
    %125 = tpu.matmul %121, %6, %cst_29 {dimension_numbers = #tpu.dot_dimension_numbers<[1], [0], [0], [1], [0, 0, 1, 1], [], []>} : vector<1x64xf32>, vector<64x256xf32>, vector<1x256xf32> -> vector<1x256xf32>
    %126 = arith.addf %124, %125 : vector<1x256xf32>
    %127 = arith.negf %126 : vector<1x256xf32>
    %128 = math.exp %127 : vector<1x256xf32>
    %cst_30 = arith.constant 1.000000e+00 : f32
    %129 = vector.broadcast %cst_30 : f32 to vector<1x256xf32>
    %130 = arith.addf %129, %128 : vector<1x256xf32>
    %131 = arith.divf %129, %130 : vector<1x256xf32>
    %132 = vector.extract_strided_slice %131 {offsets = [0, 0], sizes = [1, 64], strides = [1, 1]} : vector<1x256xf32> to vector<1x64xf32>
    %133 = vector.extract_strided_slice %131 {offsets = [0, 64], sizes = [1, 64], strides = [1, 1]} : vector<1x256xf32> to vector<1x64xf32>
    %134 = vector.extract_strided_slice %131 {offsets = [0, 128], sizes = [1, 64], strides = [1, 1]} : vector<1x256xf32> to vector<1x64xf32>
    %cst_31 = arith.constant 2.000000e+00 : f32
    %135 = vector.broadcast %cst_31 : f32 to vector<1x64xf32>
    %136 = arith.mulf %135, %134 : vector<1x64xf32>
    %cst_32 = arith.constant 1.000000e+00 : f32
    %137 = vector.broadcast %cst_32 : f32 to vector<1x64xf32>
    %138 = arith.subf %136, %137 : vector<1x64xf32>
    %139 = vector.extract_strided_slice %131 {offsets = [0, 192], sizes = [1, 64], strides = [1, 1]} : vector<1x256xf32> to vector<1x64xf32>
    %140 = arith.mulf %133, %119 : vector<1x64xf32>
    %141 = arith.mulf %132, %138 : vector<1x64xf32>
    %142 = arith.addf %140, %141 : vector<1x64xf32>
    %143 = math.tanh %142 : vector<1x64xf32>
    %144 = arith.mulf %139, %143 : vector<1x64xf32>
    %145 = vector.extract_strided_slice %144 {offsets = [0, 0], sizes = [1, 32], strides = [1, 1]} : vector<1x64xf32> to vector<1x32xf32>
    %146 = vector.extract_strided_slice %144 {offsets = [0, 32], sizes = [1, 32], strides = [1, 1]} : vector<1x64xf32> to vector<1x32xf32>
    %147 = vector.extract_strided_slice %5 {offsets = [6, 0], sizes = [1, 256], strides = [1, 1]} : vector<8x256xf32> to vector<1x256xf32>
    %cst_33 = arith.constant dense<0.000000e+00> : vector<1x256xf32>
    %148 = tpu.matmul %144, %6, %cst_33 {dimension_numbers = #tpu.dot_dimension_numbers<[1], [0], [0], [1], [0, 0, 1, 1], [], []>} : vector<1x64xf32>, vector<64x256xf32>, vector<1x256xf32> -> vector<1x256xf32>
    %149 = arith.addf %147, %148 : vector<1x256xf32>
    %150 = arith.negf %149 : vector<1x256xf32>
    %151 = math.exp %150 : vector<1x256xf32>
    %cst_34 = arith.constant 1.000000e+00 : f32
    %152 = vector.broadcast %cst_34 : f32 to vector<1x256xf32>
    %153 = arith.addf %152, %151 : vector<1x256xf32>
    %154 = arith.divf %152, %153 : vector<1x256xf32>
    %155 = vector.extract_strided_slice %154 {offsets = [0, 0], sizes = [1, 64], strides = [1, 1]} : vector<1x256xf32> to vector<1x64xf32>
    %156 = vector.extract_strided_slice %154 {offsets = [0, 64], sizes = [1, 64], strides = [1, 1]} : vector<1x256xf32> to vector<1x64xf32>
    %157 = vector.extract_strided_slice %154 {offsets = [0, 128], sizes = [1, 64], strides = [1, 1]} : vector<1x256xf32> to vector<1x64xf32>
    %cst_35 = arith.constant 2.000000e+00 : f32
    %158 = vector.broadcast %cst_35 : f32 to vector<1x64xf32>
    %159 = arith.mulf %158, %157 : vector<1x64xf32>
    %cst_36 = arith.constant 1.000000e+00 : f32
    %160 = vector.broadcast %cst_36 : f32 to vector<1x64xf32>
    %161 = arith.subf %159, %160 : vector<1x64xf32>
    %162 = vector.extract_strided_slice %154 {offsets = [0, 192], sizes = [1, 64], strides = [1, 1]} : vector<1x256xf32> to vector<1x64xf32>
    %163 = arith.mulf %156, %142 : vector<1x64xf32>
    %164 = arith.mulf %155, %161 : vector<1x64xf32>
    %165 = arith.addf %163, %164 : vector<1x64xf32>
    %166 = math.tanh %165 : vector<1x64xf32>
    %167 = arith.mulf %162, %166 : vector<1x64xf32>
    %168 = vector.extract_strided_slice %167 {offsets = [0, 0], sizes = [1, 32], strides = [1, 1]} : vector<1x64xf32> to vector<1x32xf32>
    %169 = vector.extract_strided_slice %167 {offsets = [0, 32], sizes = [1, 32], strides = [1, 1]} : vector<1x64xf32> to vector<1x32xf32>
    %170 = vector.extract_strided_slice %5 {offsets = [7, 0], sizes = [1, 256], strides = [1, 1]} : vector<8x256xf32> to vector<1x256xf32>
    %cst_37 = arith.constant dense<0.000000e+00> : vector<1x256xf32>
    %171 = tpu.matmul %167, %6, %cst_37 {dimension_numbers = #tpu.dot_dimension_numbers<[1], [0], [0], [1], [0, 0, 1, 1], [], []>} : vector<1x64xf32>, vector<64x256xf32>, vector<1x256xf32> -> vector<1x256xf32>
    %172 = arith.addf %170, %171 : vector<1x256xf32>
    %173 = arith.negf %172 : vector<1x256xf32>
    %174 = math.exp %173 : vector<1x256xf32>
    %cst_38 = arith.constant 1.000000e+00 : f32
    %175 = vector.broadcast %cst_38 : f32 to vector<1x256xf32>
    %176 = arith.addf %175, %174 : vector<1x256xf32>
    %177 = arith.divf %175, %176 : vector<1x256xf32>
    %178 = vector.extract_strided_slice %177 {offsets = [0, 0], sizes = [1, 64], strides = [1, 1]} : vector<1x256xf32> to vector<1x64xf32>
    %179 = vector.extract_strided_slice %177 {offsets = [0, 64], sizes = [1, 64], strides = [1, 1]} : vector<1x256xf32> to vector<1x64xf32>
    %180 = vector.extract_strided_slice %177 {offsets = [0, 128], sizes = [1, 64], strides = [1, 1]} : vector<1x256xf32> to vector<1x64xf32>
    %cst_39 = arith.constant 2.000000e+00 : f32
    %181 = vector.broadcast %cst_39 : f32 to vector<1x64xf32>
    %182 = arith.mulf %181, %180 : vector<1x64xf32>
    %cst_40 = arith.constant 1.000000e+00 : f32
    %183 = vector.broadcast %cst_40 : f32 to vector<1x64xf32>
    %184 = arith.subf %182, %183 : vector<1x64xf32>
    %185 = vector.extract_strided_slice %177 {offsets = [0, 192], sizes = [1, 64], strides = [1, 1]} : vector<1x256xf32> to vector<1x64xf32>
    %186 = arith.mulf %179, %165 : vector<1x64xf32>
    %187 = arith.mulf %178, %184 : vector<1x64xf32>
    %188 = arith.addf %186, %187 : vector<1x64xf32>
    %189 = math.tanh %188 : vector<1x64xf32>
    %190 = arith.mulf %185, %189 : vector<1x64xf32>
    %191 = vector.extract_strided_slice %190 {offsets = [0, 0], sizes = [1, 32], strides = [1, 1]} : vector<1x64xf32> to vector<1x32xf32>
    %192 = vector.extract_strided_slice %190 {offsets = [0, 32], sizes = [1, 32], strides = [1, 1]} : vector<1x64xf32> to vector<1x32xf32>
    %193 = tpu.concatenate %30, %53, %76, %99, %122, %145, %168, %191 in 0 : vector<1x32xf32>, vector<1x32xf32>, vector<1x32xf32>, vector<1x32xf32>, vector<1x32xf32>, vector<1x32xf32>, vector<1x32xf32>, vector<1x32xf32> -> vector<8x32xf32>
    %194 = tpu.concatenate %192, %169, %146, %123, %100, %77, %54, %31 in 0 : vector<1x32xf32>, vector<1x32xf32>, vector<1x32xf32>, vector<1x32xf32>, vector<1x32xf32>, vector<1x32xf32>, vector<1x32xf32>, vector<1x32xf32> -> vector<8x32xf32>
    %195 = tpu.concatenate %193, %194 in 1 : vector<8x32xf32>, vector<8x32xf32> -> vector<8x64xf32>
    %c0_41 = arith.constant 0 : index
    %c0_42 = arith.constant 0 : index
    %196 = vector.load %arg2[%c0_41, %c0_42] : memref<8x128xf32, #tpu.memory_space<vmem>>, vector<8x128xf32>
    %197 = tpu.concatenate %196, %195 in 1 : vector<8x128xf32>, vector<8x64xf32> -> vector<8x192xf32>
    %c0_43 = arith.constant 0 : index
    %c0_44 = arith.constant 0 : index
    %198 = vector.load %arg6[%c0_43, %c0_44] : memref<192x32xf32, #tpu.memory_space<vmem>>, vector<192x32xf32>
    %cst_45 = arith.constant dense<0.000000e+00> : vector<8x32xf32>
    %199 = tpu.matmul %197, %198, %cst_45 {dimension_numbers = #tpu.dot_dimension_numbers<[1], [0], [0], [1], [0, 0, 1, 1], [], []>} : vector<8x192xf32>, vector<192x32xf32>, vector<8x32xf32> -> vector<8x32xf32>
    %c0_46 = arith.constant 0 : index
    %c0_47 = arith.constant 0 : index
    %200 = vector.load %arg7[%c0_46, %c0_47] : memref<1x32xf32, #tpu.memory_space<vmem>>, vector<1x32xf32>
    %201 = vector.broadcast %200 : vector<1x32xf32> to vector<8x32xf32>
    %202 = arith.addf %199, %201 : vector<8x32xf32>
    %203 = arith.negf %202 : vector<8x32xf32>
    %204 = math.exp %203 : vector<8x32xf32>
    %cst_48 = arith.constant 1.000000e+00 : f32
    %205 = vector.broadcast %cst_48 : f32 to vector<8x32xf32>
    %206 = arith.addf %205, %204 : vector<8x32xf32>
    %207 = arith.divf %205, %206 : vector<8x32xf32>
    %c0_49 = arith.constant 0 : index
    %c0_50 = arith.constant 0 : index
    %208 = vector.load %arg8[%c0_49, %c0_50] : memref<32x32xf32, #tpu.memory_space<vmem>>, vector<32x32xf32>
    %cst_51 = arith.constant dense<0.000000e+00> : vector<8x32xf32>
    %209 = tpu.matmul %207, %208, %cst_51 {dimension_numbers = #tpu.dot_dimension_numbers<[1], [0], [0], [1], [0, 0, 1, 1], [], []>} : vector<8x32xf32>, vector<32x32xf32>, vector<8x32xf32> -> vector<8x32xf32>
    %c0_52 = arith.constant 0 : index
    %c0_53 = arith.constant 0 : index
    %210 = vector.load %arg9[%c0_52, %c0_53] : memref<1x32xf32, #tpu.memory_space<vmem>>, vector<1x32xf32>
    %211 = vector.broadcast %210 : vector<1x32xf32> to vector<8x32xf32>
    %212 = arith.addf %209, %211 : vector<8x32xf32>
    %213 = arith.negf %212 : vector<8x32xf32>
    %214 = math.exp %213 : vector<8x32xf32>
    %cst_54 = arith.constant 1.000000e+00 : f32
    %215 = vector.broadcast %cst_54 : f32 to vector<8x32xf32>
    %216 = arith.addf %215, %214 : vector<8x32xf32>
    %217 = arith.divf %215, %216 : vector<8x32xf32>
    %c0_55 = arith.constant 0 : index
    %c0_56 = arith.constant 0 : index
    %218 = vector.load %arg10[%c0_55, %c0_56] : memref<32x5xf32, #tpu.memory_space<vmem>>, vector<32x5xf32>
    %cst_57 = arith.constant dense<0.000000e+00> : vector<8x5xf32>
    %219 = tpu.matmul %217, %218, %cst_57 {dimension_numbers = #tpu.dot_dimension_numbers<[1], [0], [0], [1], [0, 0, 1, 1], [], []>} : vector<8x32xf32>, vector<32x5xf32>, vector<8x5xf32> -> vector<8x5xf32>
    %c0_58 = arith.constant 0 : index
    %c0_59 = arith.constant 0 : index
    %220 = vector.load %arg11[%c0_58, %c0_59] : memref<1x5xf32, #tpu.memory_space<vmem>>, vector<1x5xf32>
    %221 = vector.broadcast %220 : vector<1x5xf32> to vector<8x5xf32>
    %222 = arith.addf %219, %221 : vector<8x5xf32>
    %cst_60 = arith.constant dense<0xFF800000> : vector<8xf32>
    %223 = vector.multi_reduction <maximumf>, %222, %cst_60 [1] : vector<8x5xf32> to vector<8xf32>
    %224 = vector.shape_cast %223 : vector<8xf32> to vector<8x1xf32>
    %225 = vector.broadcast %224 : vector<8x1xf32> to vector<8x5xf32>
    %226 = arith.subf %222, %225 : vector<8x5xf32>
    %227 = math.exp %226 : vector<8x5xf32>
    %cst_61 = arith.constant dense<0.000000e+00> : vector<8xf32>
    %228 = vector.multi_reduction <add>, %227, %cst_61 [1] : vector<8x5xf32> to vector<8xf32>
    %229 = vector.shape_cast %228 : vector<8xf32> to vector<8x1xf32>
    %230 = math.log %229 : vector<8x1xf32>
    %231 = vector.broadcast %230 : vector<8x1xf32> to vector<8x5xf32>
    %232 = arith.subf %226, %231 : vector<8x5xf32>
    %c0_62 = arith.constant 0 : index
    %c0_63 = arith.constant 0 : index
    %233 = vector.load %arg12[%c0_62, %c0_63] : memref<8x5xf32, #tpu.memory_space<vmem>>, vector<8x5xf32>
    tpu.vector_store %arg12[%c0_62, %c0_63], %232 {strides = array<i32>} : memref<8x5xf32, #tpu.memory_space<vmem>>, vector<8x5xf32>,
    return
  }
  func.func @transform_0(%arg0: i32) -> (i32, i32) {
    %c0_i32 = arith.constant 0 : i32
    %c0_i32_0 = arith.constant 0 : i32
    return %arg0, %c0_i32 : i32, i32
  }
  func.func @transform_1(%arg0: i32) -> (i32, i32) {
    %c0_i32 = arith.constant 0 : i32
    %c0_i32_0 = arith.constant 0 : i32
    return %arg0, %c0_i32 : i32, i32
  }
  func.func @transform_2(%arg0: i32) -> (i32, i32) {
    %c0_i32 = arith.constant 0 : i32
    %c0_i32_0 = arith.constant 0 : i32
    %c0_i32_1 = arith.constant 0 : i32
    return %c0_i32, %c0_i32_0 : i32, i32
  }
  func.func @transform_3(%arg0: i32) -> (i32, i32) {
    %c0_i32 = arith.constant 0 : i32
    %c0_i32_0 = arith.constant 0 : i32
    %c0_i32_1 = arith.constant 0 : i32
    return %c0_i32, %c0_i32_0 : i32, i32
  }
  func.func @transform_4(%arg0: i32) -> (i32, i32) {
    %c0_i32 = arith.constant 0 : i32
    %c0_i32_0 = arith.constant 0 : i32
    %c0_i32_1 = arith.constant 0 : i32
    return %c0_i32, %c0_i32_0 : i32, i32
  }
  func.func @transform_5(%arg0: i32) -> (i32, i32) {
    %c0_i32 = arith.constant 0 : i32
    %c0_i32_0 = arith.constant 0 : i32
    %c0_i32_1 = arith.constant 0 : i32
    return %c0_i32, %c0_i32_0 : i32, i32
  }
  func.func @transform_6(%arg0: i32) -> (i32, i32) {
    %c0_i32 = arith.constant 0 : i32
    %c0_i32_0 = arith.constant 0 : i32
    %c0_i32_1 = arith.constant 0 : i32
    return %c0_i32, %c0_i32_0 : i32, i32
  }
  func.func @transform_7(%arg0: i32) -> (i32, i32) {
    %c0_i32 = arith.constant 0 : i32
    %c0_i32_0 = arith.constant 0 : i32
    %c0_i32_1 = arith.constant 0 : i32
    return %c0_i32, %c0_i32_0 : i32, i32
  }
  func.func @transform_8(%arg0: i32) -> (i32, i32) {
    %c0_i32 = arith.constant 0 : i32
    %c0_i32_0 = arith.constant 0 : i32
    %c0_i32_1 = arith.constant 0 : i32
    return %c0_i32, %c0_i32_0 : i32, i32
  }
  func.func @transform_9(%arg0: i32) -> (i32, i32) {
    %c0_i32 = arith.constant 0 : i32
    %c0_i32_0 = arith.constant 0 : i32
    %c0_i32_1 = arith.constant 0 : i32
    return %c0_i32, %c0_i32_0 : i32, i32
  }
  func.func @transform_10(%arg0: i32) -> (i32, i32) {
    %c0_i32 = arith.constant 0 : i32
    %c0_i32_0 = arith.constant 0 : i32
    %c0_i32_1 = arith.constant 0 : i32
    return %c0_i32, %c0_i32_0 : i32, i32
  }
  func.func @transform_11(%arg0: i32) -> (i32, i32) {
    %c0_i32 = arith.constant 0 : i32
    %c0_i32_0 = arith.constant 0 : i32
    return %arg0, %c0_i32 : i32, i32
  }
}

</mosaic_0001>

<bundles_post_ra>
// kernel: forward.1
= control target key start
LH: loop header
LB: loop body
LE: loop exit
PB: predicated region body
PF: predicated region fallthrough
CT: control target
= control target key end

     0   :  { %s2054_s17 = smov 0   ;;  %s2576_s0 = inlined_call_operand.vmem [shape: f32[32,32], index: 0, kind: input, shape index: {}]   ;;  %s2577_s1 = inlined_call_operand.vmem [shape: f32[32,128], index: 1, kind: input, shape index: {}]   ;;  %s2578_s2 = inlined_call_operand.vmem [shape: f32[32,256], index: 2, kind: input, shape index: {}]   ;;  %s2579_s3 = inlined_call_operand.vmem [shape: f32[1,256], index: 3, kind: input, shape index: {}]   ;;  %s2580_s4 = inlined_call_operand.vmem [shape: f32[64,256], index: 4, kind: input, shape index: {}]   ;;  %s2581_s5 = inlined_call_operand.vmem [shape: f32[192,32], index: 5, kind: input, shape index: {}]   ;;  %s2582_s6 = inlined_call_operand.vmem [shape: f32[1,32], index: 6, kind: input, shape index: {}]   ;;  %s2583_s7 = inlined_call_operand.vmem [shape: f32[32,32], index: 7, kind: input, shape index: {}]   ;;  %s2584_s8 = inlined_call_operand.vmem [shape: f32[1,32], index: 8, kind: input, shape index: {}]   ;;  %s2585_s9 = inlined_call_operand.vmem [shape: f32[32,5], index: 9, kind: input, shape index: {}]   ;;  %s2586_s10 = inlined_call_operand.vmem [shape: f32[1,5], index: 10, kind: input, shape index: {}]   ;;  %s2587_s11 = inlined_call_operand.vmem [shape: f32[32,5], index: 11, kind: output, shape index: {}]  }
   0x1 LB: > { %s1798_s18 = sadd.s32 4294967295, %s1989_s17   ;;  %p1802_p0 = scmp.ge.s32.totalorder %s1989_s17, 1  ;;  %s1989_s17 = sphi %s2054_s17, %s21_s17  }
   0x2   : > { %p345_p1 = scmp.lt.s32.totalorder %s1989_s17, 5 }
   0x4   : > { %p346_p2 = pnand %p1802_p0, %p345_p1 }
   0x5   : > { %p387_p3 = scmp.lt.s32.totalorder (!%p346_p2), %s1798_s18, 3  ;;  %s1992_s22 = smov (!%p346_p2), 64  }
   0x6   : > { %349 = sbr.rel (%p346_p2) target bundleno = 4901 (0x1325), region = 64 }
   0xb   : > { %v407_v0 = vld [vmem:[%s2578_s2 + $0x38] sm:$0xff]  ;;  %v406_v1 = vld [vmem:[%s2578_s2 + $0x30] sm:$0xff]  ;;  %v405_v2 = vld [vmem:[%s2578_s2 + $0x28] sm:$0xff]  ;;  %v1991_v4 = vmov 0.0   ;;  %s2589_s18 = smov (!%p387_p3, %s1798_s18), 3  ;;  %vm420_vm0 = vcmask 261120   ;;  %v410_v26 = vlaneseq }
   0xc   : > { %448 = vmatprep.subr.mxu0 %v407_v0  ;;  %v404_v3 = vld [vmem:[%s2578_s2 + $0x20] sm:$0xff]  ;;  %488 = vmatprep.mubr.f32.mxu0 %v1991_v4  ;;  %v403_v5 = vld [vmem:[%s2578_s2 + $0x18] sm:$0xff]  ;;  %v402_v7 = vld [vmem:[%s2578_s2 + $0x10] sm:$0xff]  ;;  %s2096_s20 = sshll.u32 %s2589_s18, 3  ;;  %vm511_vm1 = vcmask 523264   ;;  %vm1387_vm2 = vcmask 1040384  }
   0xd   : > { %449 = vmatpush1.msra.mxu0 %v406_v1  ;;  %v2081_v6 = vld [vmem:[%s2580_s4 + $0x78] sm:$0xff]  ;;  %791 = vmatprep.mubr.f32.mxu1 %v1991_v4  ;;  %v2090_v8 = vld [vmem:[%s2580_s4 + $0x70] sm:$0xff]  ;;  %v401_v9 = vld [vmem:[%s2578_s2 + $0x8] sm:$0xff]  ;;  %s390_s27 = scalar_lea.vmem %s2576_s0, %s2096_s20  ;;  %v411_v27 = vshrl.u32 %v410_v26, 7  ;;  %vm1389_vm3 = vcmask 1041408   ;;  %vm1391_vm4 = vcmask 1042432   ;;  %s394_s25 = scalar_lea.vmem %s2577_s1, %s2096_s20 }
   0xe   : > { %450 = vmatprep.subr.mxu0 %v405_v2  ;;  %743 = vmatprep.subr.mxu1 %v2081_v6  ;;  %v2101_v10 = vld [vmem:[%s2580_s4 + $0x68] sm:$0xff]  ;;  %v400_v11 = vld [vmem:[%s2578_s2] sm:$0xff]  ;;  %v2120_v14 = vld [vmem:[%s2580_s4 + $0x58] sm:$0xff]  ;;  %vm1393_vm5 = vcmask 1043456   ;;  %vm1395_vm6 = vcmask 1044480   ;;  %vm1397_vm7 = vcmask 1045504   ;;  %s398_s12 = scalar_lea.vmem %s2587_s11, %s2096_s20 }
   0xf   : > { %451 = vmatpush1.msra.mxu0 %v404_v3  ;;  %744 = vmatpush1.msra.mxu1 %v2090_v8  ;;  %v2114_v12 = vld [vmem:[%s2580_s4 + $0x60] sm:$0xff]  ;;  %v2126_v15 = vld [vmem:[%s2580_s4 + $0x50] sm:$0xff]  ;;  %v2136_v16 = vld [vmem:[%s2580_s4 + $0x48] sm:$0xff]  ;;  %v412_v28 = vsub.s32 0, %v411_v27  ;;  %v416_v30 = vsub.s32 1, %v411_v27  ;;  %vm1399_vm8 = vcmask 1046528  }
  0x10   : > { %452 = vmatprep.subr.mxu0 %v403_v5  ;;  %745 = vmatprep.subr.mxu1 %v2101_v10  ;;  %v399_v13 = vld [vmem:[%s390_s27] sm:$0xff]  ;;  %v2150_v18 = vld [vmem:[%s2580_s4 + $0x38] sm:$0xff]  ;;  %v2157_v19 = vld [vmem:[%s2580_s4 + $0x30] sm:$0xff]  ;;  %vm1993_vm9 = vmmov 0   ;;  %vm1719_vm10 = vcmask 39936  }
  0x11   : > { %453 = vmatpush1.msra.mxu0 %v402_v7  ;;  %746 = vmatpush1.msra.mxu1 %v2114_v12  ;;  %v2143_v17 = vld [vmem:[%s2580_s4 + $0x40] sm:$0xff]  ;;  %v2164_v20 = vld [vmem:[%s2580_s4 + $0x28] sm:$0xff]  ;;  %v2178_v22 = vld [vmem:[%s2580_s4 + $0x18] sm:$0xff] }
  0x12   : > { %454 = vmatprep.subr.mxu0 %v401_v9  ;;  %747 = vmatprep.subr.mxu1 %v2120_v14  ;;  %v2171_v21 = vld [vmem:[%s2580_s4 + $0x20] sm:$0xff]  ;;  %v2185_v23 = vld [vmem:[%s2580_s4 + $0x10] sm:$0xff]  ;;  %v2192_v24 = vld [vmem:[%s2580_s4 + $0x8] sm:$0xff] }
  0x13   : > { %455 = vmatpush1.msra.mxu0 %v400_v11  ;;  %748 = vmatpush1.msra.mxu1 %v2126_v15  ;;  %v2199_v25 = vld [vmem:[%s2580_s4] sm:$0xff] }
  0x14   : > { %1806 = vmatmul.mubr.msk.f32.vlgmr.msra.gmra.mxu0 %vm420_vm0, %v399_v13  ;;  %531 = vmatprep.subr.mxu0 %v2081_v6  ;;  %v408_v29 = vld [vmem:[%s2579_s3] sm:$0x3] }
  0x15   : > { %532 = vmatpush1.msra.mxu0 %v2090_v8  ;;  %579 = vmatprep.mubr.f32.mxu0 %v1991_v4  ;;  %v413_v32 = vrot.slane %v408_v29, %v412_v28  ;;  %v417_v33 = vrot.slane %v408_v29, %v416_v30 }
  0x16   : > { %533 = vmatprep.subr.mxu0 %v2101_v10  ;;  %749 = vmatprep.subr.mxu1 %v2136_v16 }
  0x17   : > { %534 = vmatpush1.msra.mxu0 %v2114_v12  ;;  %750 = vmatpush1.msra.mxu1 %v2143_v17 }
  0x18   : > { %535 = vmatprep.subr.mxu0 %v2120_v14  ;;  %751 = vmatprep.subr.mxu1 %v2150_v18 }
  0x19   : > { %536 = vmatpush1.msra.mxu0 %v2126_v15  ;;  %752 = vmatpush1.msra.mxu1 %v2157_v19 }
  0x1a   : > { %537 = vmatprep.subr.mxu0 %v2136_v16  ;;  %753 = vmatprep.subr.mxu1 %v2164_v20 }
  0x1b   : > { %538 = vmatpush1.msra.mxu0 %v2143_v17  ;;  %754 = vmatpush1.msra.mxu1 %v2171_v21 }
  0x1c   : > { %539 = vmatprep.subr.mxu0 %v2150_v18  ;;  %755 = vmatprep.subr.mxu1 %v2178_v22 }
  0x1d   : > { %540 = vmatpush1.msra.mxu0 %v2157_v19  ;;  %756 = vmatpush1.msra.mxu1 %v2185_v23 }
  0x1e   : > { %541 = vmatprep.subr.mxu0 %v2164_v20  ;;  %757 = vmatprep.subr.mxu1 %v2192_v24 }
  0x1f   : > { %542 = vmatpush1.msra.mxu0 %v2171_v21  ;;  %758 = vmatpush1.msra.mxu1 %v2199_v25 }
  0x20   : > { %543 = vmatprep.subr.mxu0 %v2178_v22  ;;  %965 = vmatprep.subr.mxu1 %v2081_v6 }
  0x21   : > { %544 = vmatpush1.msra.mxu0 %v2185_v23 }
  0x22   : > { %545 = vmatprep.subr.mxu0 %v2192_v24 }
  0x23   : > { %546 = vmatpush1.msra.mxu0 %v2199_v25 }
  0x24   : > { %580 = vmatmul.mubr.f32.vlgmr.msra.gmra.mxu0 %v1991_v4  ;;  %632 = vmatprep.subr.mxu0 %v2081_v6 }
  0x25   : > { %633 = vmatpush1.msra.mxu0 %v2090_v8  ;;  %680 = vmatprep.mubr.f32.mxu0 %v1991_v4 }
  0x26   : > { %634 = vmatprep.subr.mxu0 %v2101_v10 }
  0x27   : > { %635 = vmatpush1.msra.mxu0 %v2114_v12 }
  0x28   : > { %636 = vmatprep.subr.mxu0 %v2120_v14 }
  0x29   : > { %637 = vmatpush1.msra.mxu0 %v2126_v15 }
  0x2a   : > { %638 = vmatprep.subr.mxu0 %v2136_v16 }
  0x2b   : > { %639 = vmatpush1.msra.mxu0 %v2143_v17 }
  0x2c   : > { %640 = vmatprep.subr.mxu0 %v2150_v18 }
  0x2d   : > { %641 = vmatpush1.msra.mxu0 %v2157_v19 }
  0x2e   : > { %642 = vmatprep.subr.mxu0 %v2164_v20 }
  0x2f   : > { %643 = vmatpush1.msra.mxu0 %v2171_v21 }
  0x30   : > { %644 = vmatprep.subr.mxu0 %v2178_v22 }
  0x31   : > { %645 = vmatpush1.msra.mxu0 %v2185_v23 }
  0x32   : > { %646 = vmatprep.subr.mxu0 %v2192_v24 }
  0x33   : > { %647 = vmatpush1.msra.mxu0 %v2199_v25 }
  0x34   : > { %854 = vmatprep.subr.mxu0 %v2081_v6 }
  0xd4   : > { %v490_v31 = vpop.f32.mrf.mxu0 }
  0xd5   : > { %v2231_v35 = vadd.f32 %v490_v31, %v413_v32 }
  0xd6   : > { %v492_v34 = vpop.f32.mrf.mxu0 }
  0xd7   : > { %v2233_v37 = vadd.f32 %v492_v34, %v417_v33 }
  0xe4   : > { %v581_v36 = vpop.f32.mrf.mxu0 }
  0xe5   : > { %v586_v38 = vadd.f32 %v581_v36, %v2231_v35 }
  0xe6   : > { %v583_v39 = vpop.f32.mrf.mxu0 }
  0xe7   : > { %v1807_v40 = vmul.f32 -1.442695, %v586_v38  ;;  %v587_v41 = vadd.f32 %v583_v39, %v2233_v37 }
  0xe9   : > { %v1808_v42 = vmul.f32 -1.442695, %v587_v41  ;;  %1891 = vpow2.f32 %v1807_v40 }
  0xeb   : > { %1893 = vpow2.f32 %v1808_v42 }
  0xf6   : > { %v1892_v43 = vpop.eup %1891 }
  0xf7   : > { %v594_v46 = vadd.f32 1.0, %v1892_v43 }
  0xf8   : > { %v1894_v44 = vpop.eup %1893 }
  0xf9   : > { %v595_v45 = vadd.f32 1.0, %v1894_v44 }
  0xfb   : > { %1895 = vrcp.f32 %v595_v45 }
  0xfc   : > { %1897 = vrcp.f32 %v594_v46 }
 0x108   : > { %v1896_v47 = vpop.eup %1895 }
 0x109   : > { %v600_v48 = vmul.f32 2.0, %v1896_v47  ;;  %v1898_v50 = vpop.eup %1897 }
 0x10a   : > { %v602_v52 = vmul.f32 0.0, %v1898_v50 }
 0x10b   : > { %v1809_v49 = vadd.f32 -1.0, %v600_v48 }
 0x10d   : > { %v603_v51 = vmul.f32 %v1898_v50, %v1809_v49 }
 0x10f   : > { %605 = vrot.lane.b32.xlu0 %v603_v51, %s1992_s22 }
 0x181   : > { %v606_v53 = vpop.permute.xlu0 %605 }
 0x182   : > { %v608_v54 = vadd.f32 %v606_v53, %v602_v52 }
 0x184   : > { %1899 = vtanh.f32 %v608_v54  ;;  %v710_v9 = vrot.slane %v608_v54, 7 }
 0x191   : > { %v1900_v55 = vpop.eup %1899 }
 0x192   : > { %v2238_v56 = vmul.f32 %v1900_v55, %v1896_v47 }
 0x194   : > { %612 = vrot.lane.b32.xlu0 %v2238_v56, %s1992_s22 }
 0x206   : > { %v613_v57 = vpop.permute.xlu0 %612 }
 0x207   : > { %1810 = vmatmul.mubr.msk.f32.vlgmr.msra.gmra.mxu0 %vm511_vm1, %v613_v57 }
 0x208   : > { %855 = vmatpush1.msra.mxu0 %v2090_v8  ;;  %902 = vmatprep.mubr.f32.mxu0 %v1991_v4 }
 0x209   : > { %856 = vmatprep.subr.mxu0 %v2101_v10 }
 0x20a   : > { %857 = vmatpush1.msra.mxu0 %v2114_v12 }
 0x20b   : > { %858 = vmatprep.subr.mxu0 %v2120_v14 }
 0x20c   : > { %859 = vmatpush1.msra.mxu0 %v2126_v15 }
 0x20d   : > { %860 = vmatprep.subr.mxu0 %v2136_v16 }
 0x20e   : > { %861 = vmatpush1.msra.mxu0 %v2143_v17 }
 0x20f   : > { %862 = vmatprep.subr.mxu0 %v2150_v18 }
 0x210   : > { %863 = vmatpush1.msra.mxu0 %v2157_v19 }
 0x211   : > { %864 = vmatprep.subr.mxu0 %v2164_v20 }
 0x212   : > { %865 = vmatpush1.msra.mxu0 %v2171_v21 }
 0x213   : > { %866 = vmatprep.subr.mxu0 %v2178_v22 }
 0x214   : > { %867 = vmatpush1.msra.mxu0 %v2185_v23 }
 0x215   : > { %868 = vmatprep.subr.mxu0 %v2192_v24 }
 0x216   : > { %869 = vmatpush1.msra.mxu0 %v2199_v25 }
 0x217   : > { %1076 = vmatprep.subr.mxu0 %v2081_v6 }
 0x2c7   : > { %v682_v58 = vpop.f32.mrf.mxu0 }
 0x2c8   : > { %v689_v59 = vrot.slane %v682_v58, 7 }
 0x2c9   : > { %v684_v60 = vpop.f32.mrf.mxu0 }
 0x2ca   : > { %v693_v61 = vadd.f32 %v689_v59, %v2231_v35  ;;  %v690_v62 = vrot.slane %v684_v60, 7 }
 0x2cc   : > { %v1811_v63 = vmul.f32 -1.442695, %v693_v61  ;;  %v694_v0 = vadd.f32 %v690_v62, %v2233_v37 }
 0x2ce   : > { %1901 = vpow2.f32 %v1811_v63  ;;  %v1812_v1 = vmul.f32 -1.442695, %v694_v0 }
 0x2d0   : > { %1903 = vpow2.f32 %v1812_v1 }
 0x2db   : > { %v1902_v2 = vpop.eup %1901 }
 0x2dc   : > { %v701_v3 = vadd.f32 1.0, %v1902_v2 }
 0x2dd   : > { %v1904_v5 = vpop.eup %1903 }
 0x2de   : > { %1905 = vrcp.f32 %v701_v3  ;;  %v702_v7 = vadd.f32 1.0, %v1904_v5 }
 0x2e0   : > { %1907 = vrcp.f32 %v702_v7 }
 0x2eb   : > { %v1906_v11 = vpop.eup %1905 }
 0x2ec   : > { %v712_v13 = vmul.f32 %v1906_v11, %v710_v9 }
 0x2ed   : > { %v1908_v26 = vpop.eup %1907 }
 0x2ee   : > { %v707_v27 = vmul.f32 2.0, %v1908_v26 }
 0x2f0   : > { %v1813_v28 = vadd.f32 -1.0, %v707_v27 }
 0x2f2   : > { %v713_v29 = vmul.f32 %v1906_v11, %v1813_v28 }
 0x2f4   : > { %715 = vrot.lane.b32.xlu1 %v713_v29, %s1992_s22 }
 0x366   : > { %v716_v30 = vpop.permute.xlu1 %715 }
 0x367   : > { %v718_v31 = vadd.f32 %v716_v30, %v712_v13 }
 0x369   : > { %1909 = vtanh.f32 %v718_v31  ;;  %v821_v50 = vrot.slane %v718_v31, 7 }
 0x376   : > { %v1910_v32 = vpop.eup %1909 }
 0x377   : > { %v2263_v33 = vmul.f32 %v1910_v32, %v1908_v26 }
 0x379   : > { %v722_v34 = vrot.slane %v2263_v33, 1  ;;  %v1388_v62 = vsel %vm1387_vm2, %v2238_v56, %v2263_v33 }
 0x37b   : > { %723 = vrot.lane.b32.xlu1 %v722_v34, %s1992_s22 }
 0x3ed   : > { %v724_v36 = vpop.permute.xlu1 %723 }
 0x3ee   : > { %1814 = vmatmul.mubr.msk.f32.vlgmr.msra.gmra.mxu1 %vm511_vm1, %v724_v36 }
 0x3ef   : > { %966 = vmatpush1.msra.mxu1 %v2090_v8  ;;  %1013 = vmatprep.mubr.f32.mxu1 %v1991_v4 }
 0x3f0   : > { %967 = vmatprep.subr.mxu1 %v2101_v10 }
 0x3f1   : > { %968 = vmatpush1.msra.mxu1 %v2114_v12 }
 0x3f2   : > { %969 = vmatprep.subr.mxu1 %v2120_v14 }
 0x3f3   : > { %970 = vmatpush1.msra.mxu1 %v2126_v15 }
 0x3f4   : > { %971 = vmatprep.subr.mxu1 %v2136_v16 }
 0x3f5   : > { %972 = vmatpush1.msra.mxu1 %v2143_v17 }
 0x3f6   : > { %973 = vmatprep.subr.mxu1 %v2150_v18 }
 0x3f7   : > { %974 = vmatpush1.msra.mxu1 %v2157_v19 }
 0x3f8   : > { %975 = vmatprep.subr.mxu1 %v2164_v20 }
 0x3f9   : > { %976 = vmatpush1.msra.mxu1 %v2171_v21 }
 0x3fa   : > { %977 = vmatprep.subr.mxu1 %v2178_v22 }
 0x3fb   : > { %978 = vmatpush1.msra.mxu1 %v2185_v23 }
 0x3fc   : > { %979 = vmatprep.subr.mxu1 %v2192_v24 }
 0x3fd   : > { %980 = vmatpush1.msra.mxu1 %v2199_v25 }
 0x3fe   : > { %1187 = vmatprep.subr.mxu1 %v2081_v6 }
 0x4ae   : > { %v793_v38 = vpop.f32.mrf.mxu1 }
 0x4af   : > { %v800_v39 = vrot.slane %v793_v38, 6 }
 0x4b0   : > { %v795_v40 = vpop.f32.mrf.mxu1 }
 0x4b1   : > { %v804_v41 = vadd.f32 %v800_v39, %v2231_v35  ;;  %v801_v42 = vrot.slane %v795_v40, 6 }
 0x4b3   : > { %v1815_v43 = vmul.f32 -1.442695, %v804_v41  ;;  %v805_v44 = vadd.f32 %v801_v42, %v2233_v37 }
 0x4b5   : > { %1911 = vpow2.f32 %v1815_v43  ;;  %v1816_v45 = vmul.f32 -1.442695, %v805_v44 }
 0x4b7   : > { %1913 = vpow2.f32 %v1816_v45 }
 0x4c2   : > { %v1912_v46 = vpop.eup %1911 }
 0x4c3   : > { %v812_v47 = vadd.f32 1.0, %v1912_v46 }
 0x4c4   : > { %v1914_v48 = vpop.eup %1913 }
 0x4c5   : > { %1915 = vrcp.f32 %v812_v47  ;;  %v813_v49 = vadd.f32 1.0, %v1914_v48 }
 0x4c7   : > { %1917 = vrcp.f32 %v813_v49 }
 0x4d2   : > { %v1916_v51 = vpop.eup %1915 }
 0x4d3   : > { %v823_v52 = vmul.f32 %v1916_v51, %v821_v50 }
 0x4d4   : > { %v1918_v53 = vpop.eup %1917 }
 0x4d5   : > { %v818_v54 = vmul.f32 2.0, %v1918_v53 }
 0x4d7   : > { %v1817_v55 = vadd.f32 -1.0, %v818_v54 }
 0x4d9   : > { %v824_v57 = vmul.f32 %v1916_v51, %v1817_v55 }
 0x4db   : > { %826 = vrot.lane.b32.xlu0 %v824_v57, %s1992_s22 }
 0x54d   : > { %v827_v58 = vpop.permute.xlu0 %826 }
 0x54e   : > { %v829_v59 = vadd.f32 %v827_v58, %v823_v52 }
 0x550   : > { %1919 = vtanh.f32 %v829_v59  ;;  %v932_v31 = vrot.slane %v829_v59, 7 }
 0x55d   : > { %v1920_v60 = vpop.eup %1919 }
 0x55e   : > { %v2288_v61 = vmul.f32 %v1920_v60, %v1918_v53 }
 0x560   : > { %v833_v63 = vrot.slane %v2288_v61, 2  ;;  %v1390_v0 = vsel %vm1389_vm3, %v1388_v62, %v2288_v61 }
 0x562   : > { %834 = vrot.lane.b32.xlu1 %v833_v63, %s1992_s22 }
 0x5d4   : > { %v835_v1 = vpop.permute.xlu1 %834 }
 0x5d5   : > { %1818 = vmatmul.mubr.msk.f32.vlgmr.msra.gmra.mxu0 %vm511_vm1, %v835_v1 }
 0x5d6   : > { %1077 = vmatpush1.msra.mxu0 %v2090_v8  ;;  %1124 = vmatprep.mubr.f32.mxu0 %v1991_v4 }
 0x5d7   : > { %1078 = vmatprep.subr.mxu0 %v2101_v10 }
 0x5d8   : > { %1079 = vmatpush1.msra.mxu0 %v2114_v12 }
 0x5d9   : > { %1080 = vmatprep.subr.mxu0 %v2120_v14 }
 0x5da   : > { %1081 = vmatpush1.msra.mxu0 %v2126_v15 }
 0x5db   : > { %1082 = vmatprep.subr.mxu0 %v2136_v16 }
 0x5dc   : > { %1083 = vmatpush1.msra.mxu0 %v2143_v17 }
 0x5dd   : > { %1084 = vmatprep.subr.mxu0 %v2150_v18 }
 0x5de   : > { %1085 = vmatpush1.msra.mxu0 %v2157_v19 }
 0x5df   : > { %1086 = vmatprep.subr.mxu0 %v2164_v20 }
 0x5e0   : > { %1087 = vmatpush1.msra.mxu0 %v2171_v21 }
 0x5e1   : > { %1088 = vmatprep.subr.mxu0 %v2178_v22 }
 0x5e2   : > { %1089 = vmatpush1.msra.mxu0 %v2185_v23 }
 0x5e3   : > { %1090 = vmatprep.subr.mxu0 %v2192_v24 }
 0x5e4   : > { %1091 = vmatpush1.msra.mxu0 %v2199_v25 }
 0x5e5   : > { %1298 = vmatprep.subr.mxu0 %v2081_v6 }
 0x695   : > { %v904_v2 = vpop.f32.mrf.mxu0 }
 0x696   : > { %v911_v3 = vrot.slane %v904_v2, 5 }
 0x697   : > { %v906_v5 = vpop.f32.mrf.mxu0 }
 0x698   : > { %v915_v7 = vadd.f32 %v911_v3, %v2231_v35  ;;  %v912_v9 = vrot.slane %v906_v5, 5 }
 0x69a   : > { %v1819_v11 = vmul.f32 -1.442695, %v915_v7  ;;  %v916_v13 = vadd.f32 %v912_v9, %v2233_v37 }
 0x69c   : > { %1921 = vpow2.f32 %v1819_v11  ;;  %v1820_v26 = vmul.f32 -1.442695, %v916_v13 }
 0x69e   : > { %1923 = vpow2.f32 %v1820_v26 }
 0x6a9   : > { %v1922_v27 = vpop.eup %1921 }
 0x6aa   : > { %v923_v28 = vadd.f32 1.0, %v1922_v27 }
 0x6ab   : > { %v1924_v29 = vpop.eup %1923 }
 0x6ac   : > { %1925 = vrcp.f32 %v923_v28  ;;  %v924_v30 = vadd.f32 1.0, %v1924_v29 }
 0x6ae   : > { %1927 = vrcp.f32 %v924_v30 }
 0x6b9   : > { %v1926_v6 = vpop.eup %1925 }
 0x6ba   : > { %v934_v32 = vmul.f32 %v1926_v6, %v932_v31 }
 0x6bb   : > { %v1928_v34 = vpop.eup %1927 }
 0x6bc   : > { %v929_v36 = vmul.f32 2.0, %v1928_v34 }
 0x6be   : > { %v1821_v38 = vadd.f32 -1.0, %v929_v36 }
 0x6c0   : > { %v935_v39 = vmul.f32 %v1926_v6, %v1821_v38 }
 0x6c2   : > { %937 = vrot.lane.b32.xlu0 %v935_v39, %s1992_s22 }
 0x734   : > { %v938_v40 = vpop.permute.xlu0 %937 }
 0x735   : > { %v940_v41 = vadd.f32 %v938_v40, %v934_v32 }
 0x737   : > { %1929 = vtanh.f32 %v940_v41  ;;  %v1043_v60 = vrot.slane %v940_v41, 7 }
 0x744   : > { %v1930_v42 = vpop.eup %1929 }
 0x745   : > { %v2318_v43 = vmul.f32 %v1930_v42, %v1928_v34 }
 0x747   : > { %v944_v44 = vrot.slane %v2318_v43, 3  ;;  %v1392_v45 = vsel %vm1391_vm4, %v1390_v0, %v2318_v43 }
 0x749   : > { %945 = vrot.lane.b32.xlu1 %v944_v44, %s1992_s22 }
 0x7bb   : > { %v946_v46 = vpop.permute.xlu1 %945 }
 0x7bc   : > { %1822 = vmatmul.mubr.msk.f32.vlgmr.msra.gmra.mxu1 %vm511_vm1, %v946_v46 }
 0x7bd   : > { %1188 = vmatpush1.msra.mxu1 %v2090_v8  ;;  %1235 = vmatprep.mubr.f32.mxu1 %v1991_v4 }
 0x7be   : > { %1189 = vmatprep.subr.mxu1 %v2101_v10 }
 0x7bf   : > { %1190 = vmatpush1.msra.mxu1 %v2114_v12 }
 0x7c0   : > { %1191 = vmatprep.subr.mxu1 %v2120_v14 }
 0x7c1   : > { %1192 = vmatpush1.msra.mxu1 %v2126_v15 }
 0x7c2   : > { %1193 = vmatprep.subr.mxu1 %v2136_v16 }
 0x7c3   : > { %1194 = vmatpush1.msra.mxu1 %v2143_v17 }
 0x7c4   : > { %1195 = vmatprep.subr.mxu1 %v2150_v18 }
 0x7c5   : > { %1196 = vmatpush1.msra.mxu1 %v2157_v19 }
 0x7c6   : > { %1197 = vmatprep.subr.mxu1 %v2164_v20 }
 0x7c7   : > { %1198 = vmatpush1.msra.mxu1 %v2171_v21 }
 0x7c8   : > { %1199 = vmatprep.subr.mxu1 %v2178_v22 }
 0x7c9   : > { %1200 = vmatpush1.msra.mxu1 %v2185_v23 }
 0x7ca   : > { %1201 = vmatprep.subr.mxu1 %v2192_v24 }
 0x7cb   : > { %1202 = vmatpush1.msra.mxu1 %v2199_v25 }
 0x7cc   : > { %1469 = vmatprep.subr.mxu1 %v1991_v4 }
 0x87c   : > { %v1015_v47 = vpop.f32.mrf.mxu1 }
 0x87d   : > { %v1022_v48 = vrot.slane %v1015_v47, 4 }
 0x87e   : > { %v1017_v49 = vpop.f32.mrf.mxu1 }
 0x87f   : > { %v1026_v50 = vadd.f32 %v1022_v48, %v2231_v35  ;;  %v1023_v51 = vrot.slane %v1017_v49, 4 }
 0x881   : > { %v1823_v52 = vmul.f32 -1.442695, %v1026_v50  ;;  %v1027_v53 = vadd.f32 %v1023_v51, %v2233_v37 }
 0x883   : > { %1931 = vpow2.f32 %v1823_v52  ;;  %v1824_v54 = vmul.f32 -1.442695, %v1027_v53 }
 0x885   : > { %1933 = vpow2.f32 %v1824_v54 }
 0x890   : > { %v1932_v55 = vpop.eup %1931 }
 0x891   : > { %v1034_v57 = vadd.f32 1.0, %v1932_v55 }
 0x892   : > { %v1934_v58 = vpop.eup %1933 }
 0x893   : > { %1935 = vrcp.f32 %v1034_v57  ;;  %v1035_v59 = vadd.f32 1.0, %v1934_v58 }
 0x895   : > { %1937 = vrcp.f32 %v1035_v59 }
 0x8a0   : > { %v1936_v62 = vpop.eup %1935 }
 0x8a1   : > { %v1045_v63 = vmul.f32 %v1936_v62, %v1043_v60 }
 0x8a2   : > { %v1938_v0 = vpop.eup %1937 }
 0x8a3   : > { %v1040_v1 = vmul.f32 2.0, %v1938_v0 }
 0x8a5   : > { %v1825_v2 = vadd.f32 -1.0, %v1040_v1 }
 0x8a7   : > { %v1046_v3 = vmul.f32 %v1936_v62, %v1825_v2 }
 0x8a9   : > { %1048 = vrot.lane.b32.xlu0 %v1046_v3, %s1992_s22 }
 0x91b   : > { %v1049_v5 = vpop.permute.xlu0 %1048 }
 0x91c   : > { %v1051_v7 = vadd.f32 %v1049_v5, %v1045_v63 }
 0x91e   : > { %1939 = vtanh.f32 %v1051_v7 }
 0x92b   : > { %v1940_v9 = vpop.eup %1939 }
 0x92c   : > { %v2345_v11 = vmul.f32 %v1940_v9, %v1938_v0 }
 0x92e   : > { %v1055_v13 = vrot.slane %v2345_v11, 4  ;;  %v1394_v26 = vsel %vm1393_vm5, %v1392_v45, %v2345_v11 }
 0x930   : > { %1056 = vrot.lane.b32.xlu1 %v1055_v13, %s1992_s22 }
 0x9a2   : > { %v1057_v27 = vpop.permute.xlu1 %1056 }
 0x9a3   : > { %1826 = vmatmul.mubr.msk.f32.vlgmr.msra.gmra.mxu0 %vm511_vm1, %v1057_v27 }
 0x9a4   : > { %1299 = vmatpush1.msra.mxu0 %v2090_v8  ;;  %1346 = vmatprep.mubr.f32.mxu0 %v1991_v4 }
 0x9a5   : > { %1300 = vmatprep.subr.mxu0 %v2101_v10 }
 0x9a6   : > { %1301 = vmatpush1.msra.mxu0 %v2114_v12 }
 0x9a7   : > { %1302 = vmatprep.subr.mxu0 %v2120_v14 }
 0x9a8   : > { %1303 = vmatpush1.msra.mxu0 %v2126_v15 }
 0x9a9   : > { %1304 = vmatprep.subr.mxu0 %v2136_v16 }
 0x9aa   : > { %1305 = vmatpush1.msra.mxu0 %v2143_v17 }
 0x9ab   : > { %1306 = vmatprep.subr.mxu0 %v2150_v18 }
 0x9ac   : > { %1307 = vmatpush1.msra.mxu0 %v2157_v19 }
 0x9ad   : > { %1308 = vmatprep.subr.mxu0 %v2164_v20 }
 0x9ae   : > { %1309 = vmatpush1.msra.mxu0 %v2171_v21 }
 0x9af   : > { %1310 = vmatprep.subr.mxu0 %v2178_v22 }
 0x9b0   : > { %1311 = vmatpush1.msra.mxu0 %v2185_v23  ;;  %v1154_v23 = vrot.slane %v1051_v7, 7 }
 0x9b1   : > { %1312 = vmatprep.subr.mxu0 %v2192_v24 }
 0x9b2   : > { %1313 = vmatpush1.msra.mxu0 %v2199_v25 }
 0x9b3   : > { %1858 = vmatprep.subr.mxu0 %v1991_v4 }
 0xa63   : > { %v1126_v8 = vpop.f32.mrf.mxu0 }
 0xa64   : > { %v1133_v10 = vrot.slane %v1126_v8, 3 }
 0xa65   : > { %v1128_v12 = vpop.f32.mrf.mxu0 }
 0xa66   : > { %v1137_v14 = vadd.f32 %v1133_v10, %v2231_v35  ;;  %v1134_v15 = vrot.slane %v1128_v12, 3 }
 0xa68   : > { %v1827_v16 = vmul.f32 -1.442695, %v1137_v14  ;;  %v1138_v17 = vadd.f32 %v1134_v15, %v2233_v37 }
 0xa6a   : > { %1941 = vpow2.f32 %v1827_v16  ;;  %v1828_v18 = vmul.f32 -1.442695, %v1138_v17 }
 0xa6c   : > { %1943 = vpow2.f32 %v1828_v18 }
 0xa77   : > { %v1942_v19 = vpop.eup %1941 }
 0xa78   : > { %v1145_v20 = vadd.f32 1.0, %v1942_v19 }
 0xa79   : > { %v1944_v21 = vpop.eup %1943 }
 0xa7a   : > { %1945 = vrcp.f32 %v1145_v20  ;;  %v1146_v22 = vadd.f32 1.0, %v1944_v21 }
 0xa7c   : > { %1947 = vrcp.f32 %v1146_v22 }
 0xa87   : > { %v1946_v24 = vpop.eup %1945 }
 0xa88   : > { %v1156_v25 = vmul.f32 %v1946_v24, %v1154_v23 }
 0xa89   : > { %v1948_v28 = vpop.eup %1947 }
 0xa8a   : > { %v1151_v29 = vmul.f32 2.0, %v1948_v28 }
 0xa8c   : > { %v1829_v30 = vadd.f32 -1.0, %v1151_v29  ;;  %v1447_v29 = vld [vmem:[%s2581_s5 + $0x60] sm:$0xff] }
 0xa8e   : > { %v1157_v31 = vmul.f32 %v1946_v24, %v1829_v30  ;;  %v1446_v30 = vld [vmem:[%s2581_s5 + $0x58] sm:$0xff] }
 0xa90   : > { %1159 = vrot.lane.b32.xlu0 %v1157_v31, %s1992_s22  ;;  %v1445_v31 = vld [vmem:[%s2581_s5 + $0x50] sm:$0xff] }
 0xb02   : > { %v1160_v6 = vpop.permute.xlu0 %1159 }
 0xb03   : > { %v1162_v32 = vadd.f32 %v1160_v6, %v1156_v25  ;;  %v1449_v25 = vld [vmem:[%s2581_s5 + $0x70] sm:$0xff]  ;;  %v1444_v6 = vld [vmem:[%s2581_s5 + $0x48] sm:$0xff] }
 0xb05   : > { %1949 = vtanh.f32 %v1162_v32  ;;  %v1265_v54 = vrot.slane %v1162_v32, 7  ;;  %v1443_v32 = vld [vmem:[%s2581_s5 + $0x40] sm:$0xff] }
 0xb12   : > { %v1950_v34 = vpop.eup %1949 }
 0xb13   : > { %v2372_v36 = vmul.f32 %v1950_v34, %v1948_v28  ;;  %v1448_v28 = vld [vmem:[%s2581_s5 + $0x68] sm:$0xff]  ;;  %v1442_v34 = vld [vmem:[%s2581_s5 + $0x38] sm:$0xff] }
 0xb15   : > { %v1166_v38 = vrot.slane %v2372_v36, 5  ;;  %v1396_v39 = vsel %vm1395_vm6, %v1394_v26, %v2372_v36 }
 0xb17   : > { %1167 = vrot.lane.b32.xlu1 %v1166_v38, %s1992_s22  ;;  %v1441_v38 = vld [vmem:[%s2581_s5 + $0x30] sm:$0xff] }
 0xb89   : > { %v1168_v40 = vpop.permute.xlu1 %1167 }
 0xb8a   : > { %1830 = vmatmul.mubr.msk.f32.vlgmr.msra.gmra.mxu1 %vm511_vm1, %v1168_v40  ;;  %v1439_v40 = vld [vmem:[%s2581_s5 + $0x20] sm:$0xff] }
 0xc4a   : > { %v1237_v41 = vpop.f32.mrf.mxu1 }
 0xc4b   : > { %v1244_v42 = vrot.slane %v1237_v41, 2  ;;  %v1438_v41 = vld [vmem:[%s2581_s5 + $0x18] sm:$0xff] }
 0xc4c   : > { %v1239_v44 = vpop.f32.mrf.mxu1 }
 0xc4d   : > { %v1248_v45 = vadd.f32 %v1244_v42, %v2231_v35  ;;  %v1245_v46 = vrot.slane %v1239_v44, 2  ;;  %v1437_v42 = vld [vmem:[%s2581_s5 + $0x10] sm:$0xff]  ;;  %v1436_v44 = vld [vmem:[%s2581_s5 + $0x8] sm:$0xff] }
 0xc4f   : > { %v1831_v47 = vmul.f32 -1.442695, %v1248_v45  ;;  %v1249_v48 = vadd.f32 %v1245_v46, %v2233_v37  ;;  %v1435_v45 = vld [vmem:[%s2581_s5] sm:$0xff]  ;;  %v1458_v46 = vld [vmem:[%s2581_s5 + $0xb8] sm:$0xff] }
 0xc51   : > { %1951 = vpow2.f32 %v1831_v47  ;;  %v1832_v49 = vmul.f32 -1.442695, %v1249_v48  ;;  %v1457_v47 = vld [vmem:[%s2581_s5 + $0xb0] sm:$0xff]  ;;  %v1456_v48 = vld [vmem:[%s2581_s5 + $0xa8] sm:$0xff] }
 0xc53   : > { %1953 = vpow2.f32 %v1832_v49 }
 0xc5e   : > { %v1952_v50 = vpop.eup %1951 }
 0xc5f   : > { %v1256_v51 = vadd.f32 1.0, %v1952_v50 }
 0xc60   : > { %v1954_v52 = vpop.eup %1953 }
 0xc61   : > { %1955 = vrcp.f32 %v1256_v51  ;;  %v1257_v53 = vadd.f32 1.0, %v1954_v52  ;;  %v1455_v51 = vld [vmem:[%s2581_s5 + $0xa0] sm:$0xff]  ;;  %v1454_v52 = vld [vmem:[%s2581_s5 + $0x98] sm:$0xff] }
 0xc63   : > { %1957 = vrcp.f32 %v1257_v53  ;;  %v1453_v53 = vld [vmem:[%s2581_s5 + $0x90] sm:$0xff] }
 0xc6e   : > { %v1956_v55 = vpop.eup %1955 }
 0xc6f   : > { %v1267_v57 = vmul.f32 %v1956_v55, %v1265_v54  ;;  %v1452_v54 = vld [vmem:[%s2581_s5 + $0x88] sm:$0xff] }
 0xc70   : > { %v1958_v58 = vpop.eup %1957 }
 0xc71   : > { %v1262_v59 = vmul.f32 2.0, %v1958_v58 }
 0xc73   : > { %v1833_v60 = vadd.f32 -1.0, %v1262_v59 }
 0xc75   : > { %v1268_v62 = vmul.f32 %v1956_v55, %v1833_v60  ;;  %v1451_v55 = vld [vmem:[%s2581_s5 + $0x80] sm:$0xff] }
 0xc77   : > { %1270 = vrot.lane.b32.xlu0 %v1268_v62, %s1992_s22 }
 0xce9   : > { %v1271_v63 = vpop.permute.xlu0 %1270 }
 0xcea   : > { %v1273_v0 = vadd.f32 %v1271_v63, %v1267_v57  ;;  %v1406_v63 = vrot.slane %v2372_v36, 3  ;;  %v1416_v36 = vrot.slane %v2238_v56, 1  ;;  %v1548_v56 = vld [vmem:[%s2583_s7 + $0x18] sm:$0xff] }
 0xcec   : > { %1959 = vtanh.f32 %v1273_v0  ;;  %v1376_v19 = vrot.slane %v1273_v0, 7  ;;  %v1408_v0 = vrot.slane %v2345_v11, 1 }
 0xcf9   : > { %v1960_v1 = vpop.eup %1959 }
 0xcfa   : > { %v2382_v2 = vmul.f32 %v1960_v1, %v1958_v58 }
 0xcfc   : > { %v1277_v3 = vrot.slane %v2382_v2, 6  ;;  %v2387_v5 = vsel %vm1397_vm7, %v1396_v39, %v2382_v2  ;;  %v1440_v39 = vld [vmem:[%s2581_s5 + $0x28] sm:$0xff]  ;;  %v1404_v59 = vrot.slane %v2382_v2, 5 }
 0xcfe   : > { %1278 = vrot.lane.b32.xlu1 %v1277_v3, %s1992_s22  ;;  %v1410_v3 = vrot.slane %v2318_v43, 7 }
 0xd70   : > { %v1279_v7 = vpop.permute.xlu1 %1278 }
 0xd71   : > { %1834 = vmatmul.mubr.msk.f32.vlgmr.msra.gmra.mxu0 %vm511_vm1, %v1279_v7 }
 0xd72   : > { %1859 = vmatpush3.msra.mxu0 %v1548_v56  ;;  %1866 = vmatprep.mubr.msk.f32.mxu0 %vm1993_vm9, %v1991_v4 }
 0xd73   : > { %1860 = vmatprep.subr.mxu0 %v1991_v4 }
 0xe31   : > { %v1348_v9 = vpop.f32.mrf.mxu0 }
 0xe32   : > { %v1355_v13 = vrot.slane %v1348_v9, 1  ;;  %v1412_v9 = vrot.slane %v2288_v61, 5 }
 0xe33   : > { %v1350_v26 = vpop.f32.mrf.mxu0 }
 0xe34   : > { %v1359_v27 = vadd.f32 %v1355_v13, %v2231_v35  ;;  %v1356_v8 = vrot.slane %v1350_v26, 1 }
 0xe36   : > { %v1835_v10 = vmul.f32 -1.442695, %v1359_v27  ;;  %v1360_v12 = vadd.f32 %v1356_v8, %v2233_v37  ;;  %v1450_v37 = vld [vmem:[%s2581_s5 + $0x78] sm:$0xff]  ;;  %v1434_v8 = vld [vmem:[%s394_s25] sm:$0xff] }
 0xe37   : > { %1470 = vmatpush1.msra.mxu1 %v1450_v37  ;;  %v1635_v37 = vld [vmem:[%s2585_s9] sm:$0xff] }
 0xe38   : > { %1961 = vpow2.f32 %v1835_v10  ;;  %v1836_v14 = vmul.f32 -1.442695, %v1360_v12  ;;  %1471 = vmatprep.subr.mxu1 %v1991_v4  ;;  %v1547_v10 = vld [vmem:[%s2583_s7 + $0x10] sm:$0xff]  ;;  %v1546_v12 = vld [vmem:[%s2583_s7 + $0x8] sm:$0xff] }
 0xe39   : > { %1472 = vmatpush1.msra.mxu1 %v1449_v25  ;;  %1861 = vmatpush3.msra.mxu0 %v1547_v10  ;;  %v1841_v25 = vld [vmem:[%s2584_s8] ss:$0 sm:$0xff] }
 0xe3a   : > { %1963 = vpow2.f32 %v1836_v14  ;;  %1473 = vmatprep.subr.mxu1 %v1991_v4  ;;  %1862 = vmatprep.subr.mxu0 %v1991_v4  ;;  %v1545_v14 = vld [vmem:[%s2583_s7] sm:$0xff] }
 0xe3b   : > { %1474 = vmatpush1.msra.mxu1 %v1448_v28  ;;  %1863 = vmatpush3.msra.mxu0 %v1546_v12 }
 0xe3c   : > { %1475 = vmatprep.subr.mxu1 %v1991_v4  ;;  %1864 = vmatprep.subr.mxu0 %v1991_v4 }
 0xe3d   : > { %1476 = vmatpush1.msra.mxu1 %v1447_v29  ;;  %1865 = vmatpush3.msra.mxu0 %v1545_v14 }
 0xe3e   : > { %1477 = vmatprep.subr.mxu1 %v1991_v4  ;;  %1869 = vmatprep.subr.mxu0 %v1991_v4 }
 0xe3f   : > { %1478 = vmatpush1.msra.mxu1 %v1446_v30 }
 0xe40   : > { %1479 = vmatprep.subr.mxu1 %v1991_v4 }
 0xe41   : > { %1480 = vmatpush1.msra.mxu1 %v1445_v31 }
 0xe42   : > { %1481 = vmatprep.subr.mxu1 %v1991_v4 }
 0xe43   : > { %1482 = vmatpush1.msra.mxu1 %v1444_v6 }
 0xe44   : > { %1483 = vmatprep.subr.mxu1 %v1991_v4 }
 0xe45   : > { %v1962_v15 = vpop.eup %1961  ;;  %1484 = vmatpush1.msra.mxu1 %v1443_v32 }
 0xe46   : > { %v1367_v16 = vadd.f32 1.0, %v1962_v15  ;;  %1485 = vmatprep.subr.mxu1 %v1991_v4  ;;  %v1838_v15 = vld [vmem:[%s2582_s6] ss:$0 sm:$0xff] }
 0xe47   : > { %v1964_v17 = vpop.eup %1963  ;;  %1486 = vmatpush1.msra.mxu1 %v1442_v34 }
 0xe48   : > { %1965 = vrcp.f32 %v1367_v16  ;;  %v1368_v18 = vadd.f32 1.0, %v1964_v17  ;;  %1487 = vmatprep.subr.mxu1 %v1991_v4 }
 0xe49   : > { %1488 = vmatpush1.msra.mxu1 %v1441_v38 }
 0xe4a   : > { %1967 = vrcp.f32 %v1368_v18  ;;  %1489 = vmatprep.subr.mxu1 %v1991_v4 }
 0xe4b   : > { %1490 = vmatpush1.msra.mxu1 %v1440_v39 }
 0xe4c   : > { %1491 = vmatprep.subr.mxu1 %v1991_v4 }
 0xe4d   : > { %1492 = vmatpush1.msra.mxu1 %v1439_v40 }
 0xe4e   : > { %1493 = vmatprep.subr.mxu1 %v1991_v4 }
 0xe4f   : > { %1494 = vmatpush1.msra.mxu1 %v1438_v41 }
 0xe50   : > { %1495 = vmatprep.subr.mxu1 %v1991_v4 }
 0xe51   : > { %1496 = vmatpush1.msra.mxu1 %v1437_v42 }
 0xe52   : > { %1497 = vmatprep.subr.mxu1 %v1991_v4 }
 0xe53   : > { %1498 = vmatpush1.msra.mxu1 %v1436_v44 }
 0xe54   : > { %1499 = vmatprep.subr.mxu1 %v1991_v4 }
 0xe55   : > { %v1966_v20 = vpop.eup %1965  ;;  %1500 = vmatpush1.msra.mxu1 %v1435_v45 }
 0xe56   : > { %v2393_v21 = vmul.f32 %v1966_v20, %v1376_v19  ;;  %1517 = vmatprep.subr.mxu1 %v1991_v4 }
 0xe57   : > { %v2395_v22 = vpop.eup %1967  ;;  %1518 = vmatpush2.msra.mxu1 %v1458_v46 }
 0xe58   : > { %v1373_v35 = vmul.f32 2.0, %v2395_v22  ;;  %1519 = vmatprep.subr.mxu1 %v1991_v4 }
 0xe59   : > { %1520 = vmatpush2.msra.mxu1 %v1457_v47 }
 0xe5a   : > { %v1837_v23 = vadd.f32 -1.0, %v1373_v35  ;;  %1521 = vmatprep.subr.mxu1 %v1991_v4  ;;  %v1638_v35 = vld [vmem:[%s2585_s9 + $0x18] sm:$0xff] }
 0xe5b   : > { %1522 = vmatpush2.msra.mxu1 %v1456_v48 }
 0xe5c   : > { %v1379_v24 = vmul.f32 %v1966_v20, %v1837_v23  ;;  %1523 = vmatprep.subr.mxu1 %v1991_v4  ;;  %v1637_v23 = vld [vmem:[%s2585_s9 + $0x10] sm:$0xff] }
 0xe5d   : > { %1524 = vmatpush2.msra.mxu1 %v1455_v51 }
 0xe5e   : > { %1381 = vrot.lane.b32.xlu0 %v1379_v24, %s1992_s22  ;;  %1525 = vmatprep.subr.mxu1 %v1991_v4  ;;  %v1636_v24 = vld [vmem:[%s2585_s9 + $0x8] sm:$0xff] }
 0xe5f   : > { %1526 = vmatpush2.msra.mxu1 %v1454_v52 }
 0xe60   : > { %1527 = vmatprep.subr.mxu1 %v1991_v4 }
 0xe61   : > { %1528 = vmatpush2.msra.mxu1 %v1453_v53 }
 0xe62   : > { %1529 = vmatprep.subr.mxu1 %v1991_v4 }
 0xe63   : > { %1530 = vmatpush2.msra.mxu1 %v1452_v54 }
 0xe64   : > { %1531 = vmatprep.subr.mxu1 %v1991_v4 }
 0xe65   : > { %1532 = vmatpush2.msra.mxu1 %v1451_v55 }
 0xed0   : > { %v1382_v49 = vpop.permute.xlu0 %1381 }
 0xed1   : > { %v1384_v50 = vadd.f32 %v1382_v49, %v2393_v21 }
 0xed3   : > { %1969 = vtanh.f32 %v1384_v50 }
 0xee0   : > { %v1970_v57 = vpop.eup %1969 }
 0xee1   : > { %v1386_v58 = vmul.f32 %v1970_v57, %v2395_v22 }
 0xee3   : > { %v1400_v60 = vsel %vm1399_vm8, %v2387_v5, %v1386_v58  ;;  %v1402_v62 = vrot.slane %v1386_v58, 7  ;;  %v1414_v5 = vrot.slane %v2263_v33, 3 }
 0xee4   : > { %1426 = vrot.lane.b32.xlu1 %v1400_v60, %s1992_s22 }
 0xee5   : > { %v1418_v1 = vsel %vm1387_vm2, %v1402_v62, %v1404_v59 }
 0xee6   : > { %v1419_v7 = vsel %vm1389_vm3, %v1418_v1, %v1406_v63 }
 0xee7   : > { %v1420_v2 = vsel %vm1391_vm4, %v1419_v7, %v1408_v0 }
 0xee8   : > { %v1421_v13 = vsel %vm1393_vm5, %v1420_v2, %v1410_v3 }
 0xee9   : > { %v1422_v26 = vsel %vm1395_vm6, %v1421_v13, %v1412_v9 }
 0xeea   : > { %v1423_v11 = vsel %vm1397_vm7, %v1422_v26, %v1414_v5 }
 0xeeb   : > { %v1424_v27 = vsel %vm1399_vm8, %v1423_v11, %v1416_v36 }
 0xeec   : > { %1430 = vrot.lane.b32.xlu0 %v1424_v27, %s1992_s22 }
 0xf56   : > { %v1427_v61 = vpop.permute.xlu1 %1426 }
 0xf5e   : > { %v1431_v43 = vpop.permute.xlu0 %1430 }
 0xf5f   : > { %v1433_v33 = vsel %vm420_vm0, %v1427_v61, %v1431_v43 }
 0xf60   : > { %1839 = vmatprep.mubr.msk.f32.mxu1 %vm511_vm1, %v1433_v33 }
 0xf61   : > { %1534 = vmatmul.mubr.f32.vlgmr.msra.gmra.mxu1 %v1434_v8 }
0x1021   : > { %v1535_v16 = vpop.f32.mrf.mxu1 }
0x1022   : > { %v1536_v17 = vadd.f32 %v1838_v15, %v1535_v16 }
0x1023   : > { %v1537_v18 = vpop.f32.mrf.mxu1 }
0x1024   : > { %v1840_v19 = vmul.f32 -1.442695, %v1536_v17 }
0x1026   : > { %1971 = vpow2.f32 %v1840_v19 }
0x1033   : > { %v1972_v20 = vpop.eup %1971 }
0x1034   : > { %v1542_v21 = vadd.f32 1.0, %v1972_v20 }
0x1036   : > { %1973 = vrcp.f32 %v1542_v21 }
0x1043   : > { %v1974_v22 = vpop.eup %1973 }
0x1044   : > { %1867 = vmatmul.mubr.msk.f32.vlgmr.msra.gmra.mxu0 %vm420_vm0, %v1974_v22 }
0x1045   : > { %1877 = vmatprep.mubr.msk.f32.mxu0 %vm1993_vm9, %v1991_v4  ;;  %1870 = vmatpush3.msra.mxu0 %v1638_v35 }
0x1046   : > { %1871 = vmatprep.subr.mxu0 %v1991_v4 }
0x1047   : > { %1872 = vmatpush3.msra.mxu0 %v1637_v23 }
0x1048   : > { %1873 = vmatprep.subr.mxu0 %v1991_v4 }
0x1049   : > { %1874 = vmatpush3.msra.mxu0 %v1636_v24 }
0x104a   : > { %1875 = vmatprep.subr.mxu0 %v1991_v4  ;;  %v1844_v4 = vld [vmem:[%s2586_s10] ss:$0 sm:$0xff] }
0x104b   : > { %1876 = vmatpush3.msra.mxu0 %v1635_v37 }
0x1104   : > { %v1625_v28 = vpop.f32.mrf.mxu0 }
0x1105   : > { %v1626_v29 = vadd.f32 %v1841_v25, %v1625_v28 }
0x1106   : > { %v1868_v30 = vpop.f32.mrf.mxu0 }
0x1107   : > { %v1843_v31 = vmul.f32 -1.442695, %v1626_v29 }
0x1109   : > { %1975 = vpow2.f32 %v1843_v31 }
0x1116   : > { %v1976_v6 = vpop.eup %1975 }
0x1117   : > { %v1632_v32 = vadd.f32 1.0, %v1976_v6 }
0x1119   : > { %1977 = vrcp.f32 %v1632_v32 }
0x1126   : > { %v1978_v34 = vpop.eup %1977 }
0x1127   : > { %1878 = vmatmul.mubr.msk.f32.vlgmr.msra.gmra.mxu0 %vm420_vm0, %v1978_v34 }
0x11e7   : > { %v1715_v38 = vpop.f32.mrf.mxu0 }
0x11e8   : > { %v1716_v39 = vadd.f32 %v1844_v4, %v1715_v38 }
0x11e9   : > { %v1879_v40 = vpop.f32.mrf.mxu0 }
0x11ea   : > { %v1720_v41 = vsel %vm1719_vm10, %v1716_v39, -inf }
0x11eb   : > { %1721 = vmax.xlane.f32.xlu1 %v1720_v41 }
0x1274   : > { %v1722_v42 = vpop.xlane.xlu1 %1721 }
0x1275   : > { %v1723_v44 = vsub.f32 %v1716_v39, %v1722_v42 }
0x1277   : > { %v1724_v45 = vmul.f32 1.442695, %v1723_v44 }
0x1279   : > { %1979 = vpow2.f32 %v1724_v45 }
0x1286   : > { %v1980_v46 = vpop.eup %1979 }
0x1287   : > { %v1726_v47 = vsel %vm1719_vm10, %v1980_v46, 0.0 }
0x1288   : > { %1727 = vadd.xlane.f32.xlu0 %v1726_v47 }
0x1311   : > { %v1728_v48 = vpop.xlane.xlu0 %1727 }
0x1312   : > { %1981 = vlog2.f32 %v1728_v48 }
0x131f   : > { %v1982_v49 = vpop.eup %1981 }
0x1320   : > { %v1730_v50 = vmul.f32 0.6931472, %v1982_v49 }
0x1322   : > { %v1731_v51 = vsub.f32 %v1723_v44, %v1730_v50 }
0x1324   : > { %1732 = vst.msk [vmem:[%s398_s12] sm:$0xff] %vm1719_vm10, %v1731_v51 }
0x1325 PF: > { %s21_s17 = sadd.s32 1, %s1989_s17  }
0x1326   : > { %p18_p4 = scmp.ge.s32.totalorder %s21_s17, 6  }
0x1328   :  { %20 = sbr.rel (!%p18_p4) target bundleno = 1 (0x1), region = 97 }

</bundles_post_ra>
